<compile_context>
chip_gen: v7x
topology: tpu7x:2x2x1
jax: 0.10.0
libtpu: 0.0.40
codegen_flags: <defaults>
</compile_context>

<pallas_src>
import jax
import jax.numpy as jnp
from jax.experimental import pallas as pl
from jax.experimental.pallas import tpu as pltpu


def _iam_lstm_kernel(obs_ref, w_in_ref, b_in_ref, whh_ref,
                     w2f_ref, w2l_ref, b2_ref, w_head_ref, b_head_ref,
                     hc0_ref, gum_ref,
                     scal_ref, hc_ref):
    TB, _ = obs_ref.shape                                # time-major rows (t, b)
    _, B, Hm = hc0_ref.shape
    T = TB // B
    G = 4 * Hm                                           # gate width (i,f,g,o)

    # ---- fused input projection: obs @ [wih | w1] + [bl | b1] --------------
    # One MXU pass yields both the hoisted LSTM gate input projection and the
    # fnn pre-activation.  wih first -> the G-wide slice is vreg-aligned
    # (G == 128 for Hm == 32) and each step's slice is one contiguous vreg.
    proj = jnp.dot(obs_ref[...], w_in_ref[...],
                   preferred_element_type=jnp.float32) + b_in_ref[...]

    # ---- LSTM recurrence (PyTorch gate order i, f, g, o) --------------------
    whh = whh_ref[...]                                   # (Hm, 4*Hm), loop-invariant
    h = hc0_ref[0, :, :]                                 # (B, Hm)
    c = hc0_ref[1, :, :]                                 # (B, Hm)

    # Hoisted per-lane constants: [1,1,2,1] scale and [0,0,-1,0] shift so a
    # single full-width sigmoid covers all four gates:
    #   non-g lanes: sigmoid(x)*1 + 0            = sigmoid(x)
    #   g lanes    : sigmoid(2x)*2 - 1           = tanh(x)
    lane = jax.lax.broadcasted_iota(jnp.int32, (B, G), 1)
    is_g = jnp.logical_and(lane >= 2 * Hm, lane < 3 * Hm)
    scale = jnp.where(is_g, 2.0, 1.0).astype(jnp.float32)
    shift = jnp.where(is_g, -1.0, 0.0).astype(jnp.float32)

    hs = []
    for t in range(T):                                   # T static -> unrolled
        x_t = proj[t * B:(t + 1) * B, :G]                # contiguous (B, G) vreg
        gates = x_t + jnp.dot(h, whh, preferred_element_type=jnp.float32)
        act = jax.nn.sigmoid(gates * scale) * scale + shift   # one EUP pass
        i_g = act[:, 0 * Hm:1 * Hm]
        f_g = act[:, 1 * Hm:2 * Hm]
        g_g = act[:, 2 * Hm:3 * Hm]
        o_g = act[:, 3 * Hm:4 * Hm]
        c = f_g * c + i_g * g_g
        h = o_g * jnp.tanh(c)
        hs.append(h)                                     # keep vregs live (T small)
    hc_ref[0, :, :] = h                                  # updated hidden_memory
    hc_ref[1, :, :] = c

    lstm2d = jnp.concatenate(hs, axis=0)                 # (T*B, Hm), time-major

    # ---- fnn (ReLU) + fnn2 (split-weight Linear(cat(feat, lstm_out)) + ReLU)
    feat = jnp.maximum(proj[:, G:], 0.0)                 # (T*B, H1)
    out = jnp.maximum(
        jnp.dot(feat, w2f_ref[...], preferred_element_type=jnp.float32)
        + jnp.dot(lstm2d, w2l_ref[...], preferred_element_type=jnp.float32)
        + b2_ref[...], 0.0)                              # (T*B, H2)

    # ---- fused actor|critic head --------------------------------------------
    head = jnp.dot(out, w_head_ref[...],
                   preferred_element_type=jnp.float32) + b_head_ref[...]
    A = head.shape[-1] - 1
    logits = head[:, :A]                                 # (T*B, A)
    value = head[:, A:A + 1]                             # (T*B, 1)

    # ---- Categorical(logits).sample() via Gumbel-max + log_prob -------------
    z = logits + gum_ref[...]
    ids = jax.lax.broadcasted_iota(jnp.int32, z.shape, 1)
    zmax = jnp.max(z, axis=-1, keepdims=True)
    action = jnp.min(jnp.where(z == zmax, ids, A), axis=-1, keepdims=True)

    m = jnp.max(logits, axis=-1, keepdims=True)
    lse = m + jnp.log(jnp.sum(jnp.exp(logits - m), axis=-1, keepdims=True))
    sel = jnp.sum(jnp.where(ids == action, logits, 0.0), axis=-1, keepdims=True)
    log_prob = sel - lse                                 # (T*B, 1)

    # column stores (no lane-shuffle concat); action is exact in f32 for
    # action_size < 2**24.
    scal_ref[:, 0:1] = action.astype(jnp.float32)
    scal_ref[:, 1:2] = value
    scal_ref[:, 2:3] = log_prob


def fuse_params(params):
    """Pre-fuse weights for the kernel (shared-LHS matmul fusion)."""
    h1 = params["w1"].shape[1]
    return dict(
        w_in=jnp.concatenate([params["wih"], params["w1"]], axis=1),
        b_in=jnp.concatenate([params["bl"], params["b1"]], axis=1),
        whh=params["whh"],
        w2f=params["w2"][:h1],        # multiplies the fnn feature block
        w2l=params["w2"][h1:],        # multiplies the lstm output block
        b2=params["b2"],
        w_head=jnp.concatenate([params["wa"], params["wc"]], axis=1),
        b_head=jnp.concatenate([params["ba"], params["bc"]], axis=1),
    )


@jax.jit
def iam_lstm_policy_forward(obs, fused, hidden_memory, gumbel):
    """Pallas-backed equivalent of IAMLSTMPolicy.forward (dset=None)."""
    B, T, D = obs.shape
    Hm = hidden_memory[0].shape[-1]
    A = gumbel.shape[-1]

    # Time-major flatten in the wrapper: the kernel's first MXU op gets a 2-D
    # operand and each recurrence step slices one contiguous vreg.
    obs_tm = jnp.transpose(obs, (1, 0, 2)).reshape(T * B, D)
    gum_tm = jnp.transpose(gumbel.reshape(B, T, A), (1, 0, 2)).reshape(T * B, A)
    hc0 = jnp.concatenate([hidden_memory[0], hidden_memory[1]], axis=0)  # (2,B,Hm)

    vmem = lambda: pl.BlockSpec(memory_space=pltpu.MemorySpace.VMEM)
    n_in = 11
    scal_tm, hc = pl.pallas_call(
        _iam_lstm_kernel,
        out_shape=(
            jax.ShapeDtypeStruct((T * B, 3), jnp.float32),   # [action|value|logp]
            jax.ShapeDtypeStruct((2, B, Hm), jnp.float32),   # [h_T ; c_T]
        ),
        in_specs=[vmem() for _ in range(n_in)],
        out_specs=(vmem(), vmem()),
        input_output_aliases={9: 1},      # hc0 input buffer reused for hc output
    )(obs_tm,
      fused["w_in"], fused["b_in"], fused["whh"],
      fused["w2f"], fused["w2l"], fused["b2"],
      fused["w_head"], fused["b_head"],
      hc0, gum_tm)

    # back to the PyTorch b-major flatten order
    scal = jnp.transpose(scal_tm.reshape(T, B, 3), (1, 0, 2)).reshape(B * T, 3)
    action = scal[:, 0].astype(jnp.int32)                # (B*T,)
    value = scal[:, 1:2]                                 # (B*T, 1)
    log_prob = scal[:, 2]                                # (B*T,)
    new_hidden = (hc[0][None], hc[1][None])
    return action, value, log_prob, new_hidden


# ------------------ parameter init (deterministic, synthetic) ------------------
def init_params(key, obs_size, action_size, h1, h2, hm):
    ks = jax.random.split(key, 6)

    def lin(k, fin, fout, scale_in=None):
        s = 1.0 / jnp.sqrt(jnp.float32(scale_in if scale_in is not None else fin))
        kw, kb = jax.random.split(k)
        w = jax.random.uniform(kw, (fin, fout), jnp.float32, -s, s)
        b = jax.random.uniform(kb, (1, fout), jnp.float32, -s, s)
        return w, b

    w1, b1 = lin(ks[0], obs_size, h1)
    wih, bih = lin(ks[1], obs_size, 4 * hm, scale_in=hm)
    whh, bhh = lin(ks[2], hm, 4 * hm, scale_in=hm)
    w2, b2 = lin(ks[3], h1 + hm, h2)
    wa, ba = lin(ks[4], h2, action_size)
    wc, bc = lin(ks[5], h2, 1)
    return dict(w1=w1, b1=b1, wih=wih, whh=whh, bl=bih + bhh,
                w2=w2, b2=b2, wa=wa, ba=ba, wc=wc, bc=bc)


# ------------------ pure-JAX reference (unfused weights) ------------------
def reference_forward(obs, params, hidden_memory, gumbel):
    B, T, D = obs.shape
    Hm = hidden_memory[0].shape[-1]
    feat = jnp.maximum(obs.reshape(B * T, D) @ params["w1"] + params["b1"], 0.0)
    h, c = hidden_memory[0][0], hidden_memory[1][0]
    outs = []
    for t in range(T):
        gates = obs[:, t, :] @ params["wih"] + h @ params["whh"] + params["bl"]
        i_g = jax.nn.sigmoid(gates[:, 0 * Hm:1 * Hm])
        f_g = jax.nn.sigmoid(gates[:, 1 * Hm:2 * Hm])
        g_g = jnp.tanh(gates[:, 2 * Hm:3 * Hm])
        o_g = jax.nn.sigmoid(gates[:, 3 * Hm:4 * Hm])
        c = f_g * c + i_g * g_g
        h = o_g * jnp.tanh(c)
        outs.append(h)
    lstm2d = jnp.stack(outs, axis=1).reshape(B * T, Hm)
    out = jnp.maximum(jnp.concatenate([feat, lstm2d], -1) @ params["w2"] + params["b2"], 0.0)
    logits = out @ params["wa"] + params["ba"]
    value = out @ params["wc"] + params["bc"]
    action = jnp.argmax(logits + gumbel, axis=-1).astype(jnp.int32)
    log_prob = jnp.take_along_axis(jax.nn.log_softmax(logits, -1), action[:, None], -1)[:, 0]
    return action, value, log_prob, h, c


if __name__ == "__main__":
    # Small shapes consistent with the module's forward.
    B = 8          # num_workers (batch) -- >=8 for full sublane/MXU-row use
    T = 8          # sequence length
    OBS = 16       # obs_size
    H1 = 32        # hidden_size
    H2 = 32        # hidden_size_2
    HM = 32        # hidden_memory_size  (4*HM == 128 -> lane-aligned gates)
    A = 8          # action_size

    key = jax.random.PRNGKey(0)
    k_param, k_obs, k_gum = jax.random.split(key, 3)

    params = init_params(k_param, OBS, A, H1, H2, HM)
    fused = fuse_params(params)
    obs = jax.random.normal(k_obs, (B, T, OBS), jnp.float32)

    # self.hidden_memory = zeros (1, num_workers, hidden_memory_size)
    hidden_memory = (jnp.zeros((1, B, HM), jnp.float32),
                     jnp.zeros((1, B, HM), jnp.float32))

    # Categorical sampling randomness (Gumbel-max == multinomial sampling).
    u = jax.random.uniform(k_gum, (B * T, A), jnp.float32, 1e-6, 1.0 - 1e-6)
    gumbel = -jnp.log(-jnp.log(u))

    action, value, log_prob, new_hidden = iam_lstm_policy_forward(
        obs, fused, hidden_memory, gumbel)
    jax.block_until_ready((action, value, log_prob, new_hidden))

    # Validate against a pure-JAX reference that uses the UNFUSED weights.
    a_ref, v_ref, lp_ref, h_ref, c_ref = reference_forward(obs, params, hidden_memory, gumbel)
    assert action.shape == (B * T,) and value.shape == (B * T, 1) and log_prob.shape == (B * T,)
    assert bool(jnp.all(action == a_ref))
    assert bool(jnp.allclose(value, v_ref, atol=1e-4, rtol=1e-4))
    assert bool(jnp.allclose(log_prob, lp_ref, atol=1e-4, rtol=1e-4))
    assert bool(jnp.allclose(new_hidden[0][0], h_ref, atol=1e-4, rtol=1e-4))
    assert bool(jnp.allclose(new_hidden[1][0], c_ref, atol=1e-4, rtol=1e-4))

    print("KERNEL_OK")
</pallas_src>

<mosaic_0001>
module attributes {stable_mosaic.version = 11 : i64} {
  func.func @_iam_lstm_kernel(%arg0: memref<64x16xf32, #tpu.memory_space<vmem>>, %arg1: memref<16x160xf32, #tpu.memory_space<vmem>>, %arg2: memref<1x160xf32, #tpu.memory_space<vmem>>, %arg3: memref<32x128xf32, #tpu.memory_space<vmem>>, %arg4: memref<32x32xf32, #tpu.memory_space<vmem>>, %arg5: memref<32x32xf32, #tpu.memory_space<vmem>>, %arg6: memref<1x32xf32, #tpu.memory_space<vmem>>, %arg7: memref<32x9xf32, #tpu.memory_space<vmem>>, %arg8: memref<1x9xf32, #tpu.memory_space<vmem>>, %arg9: memref<2x8x32xf32, #tpu.memory_space<vmem>>, %arg10: memref<64x8xf32, #tpu.memory_space<vmem>>, %arg11: memref<64x3xf32, #tpu.memory_space<vmem>>, %arg12: memref<2x8x32xf32, #tpu.memory_space<vmem>>) attributes {dimension_semantics = [], scalar_prefetch = 0 : i64, scratch_operands = 0 : i64, tpu.core_type = #tpu.core_type<tc>} {
    %c0 = arith.constant 0 : index
    %c0_0 = arith.constant 0 : index
    %0 = vector.load %arg0[%c0, %c0_0] : memref<64x16xf32, #tpu.memory_space<vmem>>, vector<64x16xf32>
    %c0_1 = arith.constant 0 : index
    %c0_2 = arith.constant 0 : index
    %1 = vector.load %arg1[%c0_1, %c0_2] : memref<16x160xf32, #tpu.memory_space<vmem>>, vector<16x160xf32>
    %cst = arith.constant dense<0.000000e+00> : vector<64x160xf32>
    %2 = tpu.matmul %0, %1, %cst {dimension_numbers = #tpu.dot_dimension_numbers<[1], [0], [0], [1], [0, 0, 1, 1], [], []>} : vector<64x16xf32>, vector<16x160xf32>, vector<64x160xf32> -> vector<64x160xf32>
    %c0_3 = arith.constant 0 : index
    %c0_4 = arith.constant 0 : index
    %3 = vector.load %arg2[%c0_3, %c0_4] : memref<1x160xf32, #tpu.memory_space<vmem>>, vector<1x160xf32>
    %4 = vector.broadcast %3 : vector<1x160xf32> to vector<64x160xf32>
    %5 = arith.addf %2, %4 : vector<64x160xf32>
    %c0_5 = arith.constant 0 : index
    %c0_6 = arith.constant 0 : index
    %6 = vector.load %arg3[%c0_5, %c0_6] : memref<32x128xf32, #tpu.memory_space<vmem>>, vector<32x128xf32>
    %c0_7 = arith.constant 0 : index
    %c0_8 = arith.constant 0 : index
    %c0_9 = arith.constant 0 : index
    %7 = vector.load %arg9[%c0_7, %c0_8, %c0_9] : memref<2x8x32xf32, #tpu.memory_space<vmem>>, vector<1x8x32xf32>
    %8 = vector.shape_cast %7 : vector<1x8x32xf32> to vector<8x32xf32>
    %c1 = arith.constant 1 : index
    %c0_10 = arith.constant 0 : index
    %c0_11 = arith.constant 0 : index
    %9 = vector.load %arg9[%c1, %c0_10, %c0_11] : memref<2x8x32xf32, #tpu.memory_space<vmem>>, vector<1x8x32xf32>
    %10 = vector.shape_cast %9 : vector<1x8x32xf32> to vector<8x32xf32>
    %11 = tpu.iota {dimensions = array<i32: 1>} : vector<8x128xi32>
    %c64_i32 = arith.constant 64 : i32
    %12 = vector.broadcast %c64_i32 : i32 to vector<8x128xi32>
    %13 = arith.cmpi sge, %11, %12 : vector<8x128xi32>
    %c96_i32 = arith.constant 96 : i32
    %14 = vector.broadcast %c96_i32 : i32 to vector<8x128xi32>
    %15 = arith.cmpi slt, %11, %14 : vector<8x128xi32>
    %16 = arith.andi %13, %15 : vector<8x128xi1>
    %cst_12 = arith.constant 2.000000e+00 : f32
    %cst_13 = arith.constant 1.000000e+00 : f32
    %17 = vector.broadcast %cst_12 : f32 to vector<8x128xf32>
    %18 = vector.broadcast %cst_13 : f32 to vector<8x128xf32>
    %19 = arith.select %16, %17, %18 : vector<8x128xi1>, vector<8x128xf32>
    %cst_14 = arith.constant -1.000000e+00 : f32
    %cst_15 = arith.constant 0.000000e+00 : f32
    %20 = vector.broadcast %cst_14 : f32 to vector<8x128xf32>
    %21 = vector.broadcast %cst_15 : f32 to vector<8x128xf32>
    %22 = arith.select %16, %20, %21 : vector<8x128xi1>, vector<8x128xf32>
    %23 = vector.extract_strided_slice %5 {offsets = [0, 0], sizes = [8, 128], strides = [1, 1]} : vector<64x160xf32> to vector<8x128xf32>
    %cst_16 = arith.constant dense<0.000000e+00> : vector<8x128xf32>
    %24 = tpu.matmul %8, %6, %cst_16 {dimension_numbers = #tpu.dot_dimension_numbers<[1], [0], [0], [1], [0, 0, 1, 1], [], []>} : vector<8x32xf32>, vector<32x128xf32>, vector<8x128xf32> -> vector<8x128xf32>
    %25 = arith.addf %23, %24 : vector<8x128xf32>
    %26 = arith.mulf %25, %19 : vector<8x128xf32>
    %27 = arith.negf %26 : vector<8x128xf32>
    %28 = math.exp %27 : vector<8x128xf32>
    %cst_17 = arith.constant 1.000000e+00 : f32
    %29 = vector.broadcast %cst_17 : f32 to vector<8x128xf32>
    %30 = arith.addf %29, %28 : vector<8x128xf32>
    %31 = arith.divf %29, %30 : vector<8x128xf32>
    %32 = arith.mulf %31, %19 : vector<8x128xf32>
    %33 = arith.addf %32, %22 : vector<8x128xf32>
    %34 = vector.extract_strided_slice %33 {offsets = [0, 0], sizes = [8, 32], strides = [1, 1]} : vector<8x128xf32> to vector<8x32xf32>
    %35 = vector.extract_strided_slice %33 {offsets = [0, 32], sizes = [8, 32], strides = [1, 1]} : vector<8x128xf32> to vector<8x32xf32>
    %36 = vector.extract_strided_slice %33 {offsets = [0, 64], sizes = [8, 32], strides = [1, 1]} : vector<8x128xf32> to vector<8x32xf32>
    %37 = vector.extract_strided_slice %33 {offsets = [0, 96], sizes = [8, 32], strides = [1, 1]} : vector<8x128xf32> to vector<8x32xf32>
    %38 = arith.mulf %35, %10 : vector<8x32xf32>
    %39 = arith.mulf %34, %36 : vector<8x32xf32>
    %40 = arith.addf %38, %39 : vector<8x32xf32>
    %41 = math.tanh %40 : vector<8x32xf32>
    %42 = arith.mulf %37, %41 : vector<8x32xf32>
    %43 = vector.extract_strided_slice %5 {offsets = [8, 0], sizes = [8, 128], strides = [1, 1]} : vector<64x160xf32> to vector<8x128xf32>
    %cst_18 = arith.constant dense<0.000000e+00> : vector<8x128xf32>
    %44 = tpu.matmul %42, %6, %cst_18 {dimension_numbers = #tpu.dot_dimension_numbers<[1], [0], [0], [1], [0, 0, 1, 1], [], []>} : vector<8x32xf32>, vector<32x128xf32>, vector<8x128xf32> -> vector<8x128xf32>
    %45 = arith.addf %43, %44 : vector<8x128xf32>
    %46 = arith.mulf %45, %19 : vector<8x128xf32>
    %47 = arith.negf %46 : vector<8x128xf32>
    %48 = math.exp %47 : vector<8x128xf32>
    %cst_19 = arith.constant 1.000000e+00 : f32
    %49 = vector.broadcast %cst_19 : f32 to vector<8x128xf32>
    %50 = arith.addf %49, %48 : vector<8x128xf32>
    %51 = arith.divf %49, %50 : vector<8x128xf32>
    %52 = arith.mulf %51, %19 : vector<8x128xf32>
    %53 = arith.addf %52, %22 : vector<8x128xf32>
    %54 = vector.extract_strided_slice %53 {offsets = [0, 0], sizes = [8, 32], strides = [1, 1]} : vector<8x128xf32> to vector<8x32xf32>
    %55 = vector.extract_strided_slice %53 {offsets = [0, 32], sizes = [8, 32], strides = [1, 1]} : vector<8x128xf32> to vector<8x32xf32>
    %56 = vector.extract_strided_slice %53 {offsets = [0, 64], sizes = [8, 32], strides = [1, 1]} : vector<8x128xf32> to vector<8x32xf32>
    %57 = vector.extract_strided_slice %53 {offsets = [0, 96], sizes = [8, 32], strides = [1, 1]} : vector<8x128xf32> to vector<8x32xf32>
    %58 = arith.mulf %55, %40 : vector<8x32xf32>
    %59 = arith.mulf %54, %56 : vector<8x32xf32>
    %60 = arith.addf %58, %59 : vector<8x32xf32>
    %61 = math.tanh %60 : vector<8x32xf32>
    %62 = arith.mulf %57, %61 : vector<8x32xf32>
    %63 = vector.extract_strided_slice %5 {offsets = [16, 0], sizes = [8, 128], strides = [1, 1]} : vector<64x160xf32> to vector<8x128xf32>
    %cst_20 = arith.constant dense<0.000000e+00> : vector<8x128xf32>
    %64 = tpu.matmul %62, %6, %cst_20 {dimension_numbers = #tpu.dot_dimension_numbers<[1], [0], [0], [1], [0, 0, 1, 1], [], []>} : vector<8x32xf32>, vector<32x128xf32>, vector<8x128xf32> -> vector<8x128xf32>
    %65 = arith.addf %63, %64 : vector<8x128xf32>
    %66 = arith.mulf %65, %19 : vector<8x128xf32>
    %67 = arith.negf %66 : vector<8x128xf32>
    %68 = math.exp %67 : vector<8x128xf32>
    %cst_21 = arith.constant 1.000000e+00 : f32
    %69 = vector.broadcast %cst_21 : f32 to vector<8x128xf32>
    %70 = arith.addf %69, %68 : vector<8x128xf32>
    %71 = arith.divf %69, %70 : vector<8x128xf32>
    %72 = arith.mulf %71, %19 : vector<8x128xf32>
    %73 = arith.addf %72, %22 : vector<8x128xf32>
    %74 = vector.extract_strided_slice %73 {offsets = [0, 0], sizes = [8, 32], strides = [1, 1]} : vector<8x128xf32> to vector<8x32xf32>
    %75 = vector.extract_strided_slice %73 {offsets = [0, 32], sizes = [8, 32], strides = [1, 1]} : vector<8x128xf32> to vector<8x32xf32>
    %76 = vector.extract_strided_slice %73 {offsets = [0, 64], sizes = [8, 32], strides = [1, 1]} : vector<8x128xf32> to vector<8x32xf32>
    %77 = vector.extract_strided_slice %73 {offsets = [0, 96], sizes = [8, 32], strides = [1, 1]} : vector<8x128xf32> to vector<8x32xf32>
    %78 = arith.mulf %75, %60 : vector<8x32xf32>
    %79 = arith.mulf %74, %76 : vector<8x32xf32>
    %80 = arith.addf %78, %79 : vector<8x32xf32>
    %81 = math.tanh %80 : vector<8x32xf32>
    %82 = arith.mulf %77, %81 : vector<8x32xf32>
    %83 = vector.extract_strided_slice %5 {offsets = [24, 0], sizes = [8, 128], strides = [1, 1]} : vector<64x160xf32> to vector<8x128xf32>
    %cst_22 = arith.constant dense<0.000000e+00> : vector<8x128xf32>
    %84 = tpu.matmul %82, %6, %cst_22 {dimension_numbers = #tpu.dot_dimension_numbers<[1], [0], [0], [1], [0, 0, 1, 1], [], []>} : vector<8x32xf32>, vector<32x128xf32>, vector<8x128xf32> -> vector<8x128xf32>
    %85 = arith.addf %83, %84 : vector<8x128xf32>
    %86 = arith.mulf %85, %19 : vector<8x128xf32>
    %87 = arith.negf %86 : vector<8x128xf32>
    %88 = math.exp %87 : vector<8x128xf32>
    %cst_23 = arith.constant 1.000000e+00 : f32
    %89 = vector.broadcast %cst_23 : f32 to vector<8x128xf32>
    %90 = arith.addf %89, %88 : vector<8x128xf32>
    %91 = arith.divf %89, %90 : vector<8x128xf32>
    %92 = arith.mulf %91, %19 : vector<8x128xf32>
    %93 = arith.addf %92, %22 : vector<8x128xf32>
    %94 = vector.extract_strided_slice %93 {offsets = [0, 0], sizes = [8, 32], strides = [1, 1]} : vector<8x128xf32> to vector<8x32xf32>
    %95 = vector.extract_strided_slice %93 {offsets = [0, 32], sizes = [8, 32], strides = [1, 1]} : vector<8x128xf32> to vector<8x32xf32>
    %96 = vector.extract_strided_slice %93 {offsets = [0, 64], sizes = [8, 32], strides = [1, 1]} : vector<8x128xf32> to vector<8x32xf32>
    %97 = vector.extract_strided_slice %93 {offsets = [0, 96], sizes = [8, 32], strides = [1, 1]} : vector<8x128xf32> to vector<8x32xf32>
    %98 = arith.mulf %95, %80 : vector<8x32xf32>
    %99 = arith.mulf %94, %96 : vector<8x32xf32>
    %100 = arith.addf %98, %99 : vector<8x32xf32>
    %101 = math.tanh %100 : vector<8x32xf32>
    %102 = arith.mulf %97, %101 : vector<8x32xf32>
    %103 = vector.extract_strided_slice %5 {offsets = [32, 0], sizes = [8, 128], strides = [1, 1]} : vector<64x160xf32> to vector<8x128xf32>
    %cst_24 = arith.constant dense<0.000000e+00> : vector<8x128xf32>
    %104 = tpu.matmul %102, %6, %cst_24 {dimension_numbers = #tpu.dot_dimension_numbers<[1], [0], [0], [1], [0, 0, 1, 1], [], []>} : vector<8x32xf32>, vector<32x128xf32>, vector<8x128xf32> -> vector<8x128xf32>
    %105 = arith.addf %103, %104 : vector<8x128xf32>
    %106 = arith.mulf %105, %19 : vector<8x128xf32>
    %107 = arith.negf %106 : vector<8x128xf32>
    %108 = math.exp %107 : vector<8x128xf32>
    %cst_25 = arith.constant 1.000000e+00 : f32
    %109 = vector.broadcast %cst_25 : f32 to vector<8x128xf32>
    %110 = arith.addf %109, %108 : vector<8x128xf32>
    %111 = arith.divf %109, %110 : vector<8x128xf32>
    %112 = arith.mulf %111, %19 : vector<8x128xf32>
    %113 = arith.addf %112, %22 : vector<8x128xf32>
    %114 = vector.extract_strided_slice %113 {offsets = [0, 0], sizes = [8, 32], strides = [1, 1]} : vector<8x128xf32> to vector<8x32xf32>
    %115 = vector.extract_strided_slice %113 {offsets = [0, 32], sizes = [8, 32], strides = [1, 1]} : vector<8x128xf32> to vector<8x32xf32>
    %116 = vector.extract_strided_slice %113 {offsets = [0, 64], sizes = [8, 32], strides = [1, 1]} : vector<8x128xf32> to vector<8x32xf32>
    %117 = vector.extract_strided_slice %113 {offsets = [0, 96], sizes = [8, 32], strides = [1, 1]} : vector<8x128xf32> to vector<8x32xf32>
    %118 = arith.mulf %115, %100 : vector<8x32xf32>
    %119 = arith.mulf %114, %116 : vector<8x32xf32>
    %120 = arith.addf %118, %119 : vector<8x32xf32>
    %121 = math.tanh %120 : vector<8x32xf32>
    %122 = arith.mulf %117, %121 : vector<8x32xf32>
    %123 = vector.extract_strided_slice %5 {offsets = [40, 0], sizes = [8, 128], strides = [1, 1]} : vector<64x160xf32> to vector<8x128xf32>
    %cst_26 = arith.constant dense<0.000000e+00> : vector<8x128xf32>
    %124 = tpu.matmul %122, %6, %cst_26 {dimension_numbers = #tpu.dot_dimension_numbers<[1], [0], [0], [1], [0, 0, 1, 1], [], []>} : vector<8x32xf32>, vector<32x128xf32>, vector<8x128xf32> -> vector<8x128xf32>
    %125 = arith.addf %123, %124 : vector<8x128xf32>
    %126 = arith.mulf %125, %19 : vector<8x128xf32>
    %127 = arith.negf %126 : vector<8x128xf32>
    %128 = math.exp %127 : vector<8x128xf32>
    %cst_27 = arith.constant 1.000000e+00 : f32
    %129 = vector.broadcast %cst_27 : f32 to vector<8x128xf32>
    %130 = arith.addf %129, %128 : vector<8x128xf32>
    %131 = arith.divf %129, %130 : vector<8x128xf32>
    %132 = arith.mulf %131, %19 : vector<8x128xf32>
    %133 = arith.addf %132, %22 : vector<8x128xf32>
    %134 = vector.extract_strided_slice %133 {offsets = [0, 0], sizes = [8, 32], strides = [1, 1]} : vector<8x128xf32> to vector<8x32xf32>
    %135 = vector.extract_strided_slice %133 {offsets = [0, 32], sizes = [8, 32], strides = [1, 1]} : vector<8x128xf32> to vector<8x32xf32>
    %136 = vector.extract_strided_slice %133 {offsets = [0, 64], sizes = [8, 32], strides = [1, 1]} : vector<8x128xf32> to vector<8x32xf32>
    %137 = vector.extract_strided_slice %133 {offsets = [0, 96], sizes = [8, 32], strides = [1, 1]} : vector<8x128xf32> to vector<8x32xf32>
    %138 = arith.mulf %135, %120 : vector<8x32xf32>
    %139 = arith.mulf %134, %136 : vector<8x32xf32>
    %140 = arith.addf %138, %139 : vector<8x32xf32>
    %141 = math.tanh %140 : vector<8x32xf32>
    %142 = arith.mulf %137, %141 : vector<8x32xf32>
    %143 = vector.extract_strided_slice %5 {offsets = [48, 0], sizes = [8, 128], strides = [1, 1]} : vector<64x160xf32> to vector<8x128xf32>
    %cst_28 = arith.constant dense<0.000000e+00> : vector<8x128xf32>
    %144 = tpu.matmul %142, %6, %cst_28 {dimension_numbers = #tpu.dot_dimension_numbers<[1], [0], [0], [1], [0, 0, 1, 1], [], []>} : vector<8x32xf32>, vector<32x128xf32>, vector<8x128xf32> -> vector<8x128xf32>
    %145 = arith.addf %143, %144 : vector<8x128xf32>
    %146 = arith.mulf %145, %19 : vector<8x128xf32>
    %147 = arith.negf %146 : vector<8x128xf32>
    %148 = math.exp %147 : vector<8x128xf32>
    %cst_29 = arith.constant 1.000000e+00 : f32
    %149 = vector.broadcast %cst_29 : f32 to vector<8x128xf32>
    %150 = arith.addf %149, %148 : vector<8x128xf32>
    %151 = arith.divf %149, %150 : vector<8x128xf32>
    %152 = arith.mulf %151, %19 : vector<8x128xf32>
    %153 = arith.addf %152, %22 : vector<8x128xf32>
    %154 = vector.extract_strided_slice %153 {offsets = [0, 0], sizes = [8, 32], strides = [1, 1]} : vector<8x128xf32> to vector<8x32xf32>
    %155 = vector.extract_strided_slice %153 {offsets = [0, 32], sizes = [8, 32], strides = [1, 1]} : vector<8x128xf32> to vector<8x32xf32>
    %156 = vector.extract_strided_slice %153 {offsets = [0, 64], sizes = [8, 32], strides = [1, 1]} : vector<8x128xf32> to vector<8x32xf32>
    %157 = vector.extract_strided_slice %153 {offsets = [0, 96], sizes = [8, 32], strides = [1, 1]} : vector<8x128xf32> to vector<8x32xf32>
    %158 = arith.mulf %155, %140 : vector<8x32xf32>
    %159 = arith.mulf %154, %156 : vector<8x32xf32>
    %160 = arith.addf %158, %159 : vector<8x32xf32>
    %161 = math.tanh %160 : vector<8x32xf32>
    %162 = arith.mulf %157, %161 : vector<8x32xf32>
    %163 = vector.extract_strided_slice %5 {offsets = [56, 0], sizes = [8, 128], strides = [1, 1]} : vector<64x160xf32> to vector<8x128xf32>
    %cst_30 = arith.constant dense<0.000000e+00> : vector<8x128xf32>
    %164 = tpu.matmul %162, %6, %cst_30 {dimension_numbers = #tpu.dot_dimension_numbers<[1], [0], [0], [1], [0, 0, 1, 1], [], []>} : vector<8x32xf32>, vector<32x128xf32>, vector<8x128xf32> -> vector<8x128xf32>
    %165 = arith.addf %163, %164 : vector<8x128xf32>
    %166 = arith.mulf %165, %19 : vector<8x128xf32>
    %167 = arith.negf %166 : vector<8x128xf32>
    %168 = math.exp %167 : vector<8x128xf32>
    %cst_31 = arith.constant 1.000000e+00 : f32
    %169 = vector.broadcast %cst_31 : f32 to vector<8x128xf32>
    %170 = arith.addf %169, %168 : vector<8x128xf32>
    %171 = arith.divf %169, %170 : vector<8x128xf32>
    %172 = arith.mulf %171, %19 : vector<8x128xf32>
    %173 = arith.addf %172, %22 : vector<8x128xf32>
    %174 = vector.extract_strided_slice %173 {offsets = [0, 0], sizes = [8, 32], strides = [1, 1]} : vector<8x128xf32> to vector<8x32xf32>
    %175 = vector.extract_strided_slice %173 {offsets = [0, 32], sizes = [8, 32], strides = [1, 1]} : vector<8x128xf32> to vector<8x32xf32>
    %176 = vector.extract_strided_slice %173 {offsets = [0, 64], sizes = [8, 32], strides = [1, 1]} : vector<8x128xf32> to vector<8x32xf32>
    %177 = vector.extract_strided_slice %173 {offsets = [0, 96], sizes = [8, 32], strides = [1, 1]} : vector<8x128xf32> to vector<8x32xf32>
    %178 = arith.mulf %175, %160 : vector<8x32xf32>
    %179 = arith.mulf %174, %176 : vector<8x32xf32>
    %180 = arith.addf %178, %179 : vector<8x32xf32>
    %181 = math.tanh %180 : vector<8x32xf32>
    %182 = arith.mulf %177, %181 : vector<8x32xf32>
    %c0_32 = arith.constant 0 : index
    %c0_33 = arith.constant 0 : index
    %c0_34 = arith.constant 0 : index
    %183 = vector.load %arg12[%c0_32, %c0_33, %c0_34] : memref<2x8x32xf32, #tpu.memory_space<vmem>>, vector<1x8x32xf32>
    %184 = vector.shape_cast %183 : vector<1x8x32xf32> to vector<8x32xf32>
    %185 = vector.shape_cast %182 : vector<8x32xf32> to vector<1x8x32xf32>
    tpu.vector_store %arg12[%c0_32, %c0_33, %c0_34], %185 {strides = array<i32>} : memref<2x8x32xf32, #tpu.memory_space<vmem>>, vector<1x8x32xf32>,
    %c1_35 = arith.constant 1 : index
    %c0_36 = arith.constant 0 : index
    %c0_37 = arith.constant 0 : index
    %186 = vector.load %arg12[%c1_35, %c0_36, %c0_37] : memref<2x8x32xf32, #tpu.memory_space<vmem>>, vector<1x8x32xf32>
    %187 = vector.shape_cast %186 : vector<1x8x32xf32> to vector<8x32xf32>
    %188 = vector.shape_cast %180 : vector<8x32xf32> to vector<1x8x32xf32>
    tpu.vector_store %arg12[%c1_35, %c0_36, %c0_37], %188 {strides = array<i32>} : memref<2x8x32xf32, #tpu.memory_space<vmem>>, vector<1x8x32xf32>,
    %189 = tpu.concatenate %42, %62, %82, %102, %122, %142, %162, %182 in 0 : vector<8x32xf32>, vector<8x32xf32>, vector<8x32xf32>, vector<8x32xf32>, vector<8x32xf32>, vector<8x32xf32>, vector<8x32xf32>, vector<8x32xf32> -> vector<64x32xf32>
    %190 = vector.extract_strided_slice %5 {offsets = [0, 128], sizes = [64, 32], strides = [1, 1]} : vector<64x160xf32> to vector<64x32xf32>
    %cst_38 = arith.constant 0.000000e+00 : f32
    %191 = vector.broadcast %cst_38 : f32 to vector<64x32xf32>
    %192 = arith.maximumf %190, %191 : vector<64x32xf32>
    %c0_39 = arith.constant 0 : index
    %c0_40 = arith.constant 0 : index
    %193 = vector.load %arg4[%c0_39, %c0_40] : memref<32x32xf32, #tpu.memory_space<vmem>>, vector<32x32xf32>
    %cst_41 = arith.constant dense<0.000000e+00> : vector<64x32xf32>
    %194 = tpu.matmul %192, %193, %cst_41 {dimension_numbers = #tpu.dot_dimension_numbers<[1], [0], [0], [1], [0, 0, 1, 1], [], []>} : vector<64x32xf32>, vector<32x32xf32>, vector<64x32xf32> -> vector<64x32xf32>
    %c0_42 = arith.constant 0 : index
    %c0_43 = arith.constant 0 : index
    %195 = vector.load %arg5[%c0_42, %c0_43] : memref<32x32xf32, #tpu.memory_space<vmem>>, vector<32x32xf32>
    %cst_44 = arith.constant dense<0.000000e+00> : vector<64x32xf32>
    %196 = tpu.matmul %189, %195, %cst_44 {dimension_numbers = #tpu.dot_dimension_numbers<[1], [0], [0], [1], [0, 0, 1, 1], [], []>} : vector<64x32xf32>, vector<32x32xf32>, vector<64x32xf32> -> vector<64x32xf32>
    %197 = arith.addf %194, %196 : vector<64x32xf32>
    %c0_45 = arith.constant 0 : index
    %c0_46 = arith.constant 0 : index
    %198 = vector.load %arg6[%c0_45, %c0_46] : memref<1x32xf32, #tpu.memory_space<vmem>>, vector<1x32xf32>
    %199 = vector.broadcast %198 : vector<1x32xf32> to vector<64x32xf32>
    %200 = arith.addf %197, %199 : vector<64x32xf32>
    %cst_47 = arith.constant 0.000000e+00 : f32
    %201 = vector.broadcast %cst_47 : f32 to vector<64x32xf32>
    %202 = arith.maximumf %200, %201 : vector<64x32xf32>
    %c0_48 = arith.constant 0 : index
    %c0_49 = arith.constant 0 : index
    %203 = vector.load %arg7[%c0_48, %c0_49] : memref<32x9xf32, #tpu.memory_space<vmem>>, vector<32x9xf32>
    %cst_50 = arith.constant dense<0.000000e+00> : vector<64x9xf32>
    %204 = tpu.matmul %202, %203, %cst_50 {dimension_numbers = #tpu.dot_dimension_numbers<[1], [0], [0], [1], [0, 0, 1, 1], [], []>} : vector<64x32xf32>, vector<32x9xf32>, vector<64x9xf32> -> vector<64x9xf32>
    %c0_51 = arith.constant 0 : index
    %c0_52 = arith.constant 0 : index
    %205 = vector.load %arg8[%c0_51, %c0_52] : memref<1x9xf32, #tpu.memory_space<vmem>>, vector<1x9xf32>
    %206 = vector.broadcast %205 : vector<1x9xf32> to vector<64x9xf32>
    %207 = arith.addf %204, %206 : vector<64x9xf32>
    %208 = vector.extract_strided_slice %207 {offsets = [0, 0], sizes = [64, 8], strides = [1, 1]} : vector<64x9xf32> to vector<64x8xf32>
    %209 = vector.extract_strided_slice %207 {offsets = [0, 8], sizes = [64, 1], strides = [1, 1]} : vector<64x9xf32> to vector<64x1xf32>
    %c0_53 = arith.constant 0 : index
    %c0_54 = arith.constant 0 : index
    %210 = vector.load %arg10[%c0_53, %c0_54] : memref<64x8xf32, #tpu.memory_space<vmem>>, vector<64x8xf32>
    %211 = arith.addf %208, %210 : vector<64x8xf32>
    %212 = tpu.iota {dimensions = array<i32: 1>} : vector<64x8xi32>
    %cst_55 = arith.constant dense<0xFF800000> : vector<64xf32>
    %213 = vector.multi_reduction <maximumf>, %211, %cst_55 [1] : vector<64x8xf32> to vector<64xf32>
    %214 = vector.shape_cast %213 : vector<64xf32> to vector<64x1xf32>
    %215 = vector.broadcast %214 : vector<64x1xf32> to vector<64x8xf32>
    %216 = arith.cmpf oeq, %211, %215 : vector<64x8xf32>
    %c8_i32 = arith.constant 8 : i32
    %217 = vector.broadcast %c8_i32 : i32 to vector<64x8xi32>
    %218 = arith.select %216, %212, %217 : vector<64x8xi1>, vector<64x8xi32>
    %cst_56 = arith.constant dense<2147483647> : vector<64xi32>
    %219 = vector.multi_reduction <minsi>, %218, %cst_56 [1] : vector<64x8xi32> to vector<64xi32>
    %220 = vector.shape_cast %219 : vector<64xi32> to vector<64x1xi32>
    %cst_57 = arith.constant dense<0xFF800000> : vector<64xf32>
    %221 = vector.multi_reduction <maximumf>, %208, %cst_57 [1] : vector<64x8xf32> to vector<64xf32>
    %222 = vector.shape_cast %221 : vector<64xf32> to vector<64x1xf32>
    %223 = vector.broadcast %222 : vector<64x1xf32> to vector<64x8xf32>
    %224 = arith.subf %208, %223 : vector<64x8xf32>
    %225 = math.exp %224 : vector<64x8xf32>
    %cst_58 = arith.constant dense<0.000000e+00> : vector<64xf32>
    %226 = vector.multi_reduction <add>, %225, %cst_58 [1] : vector<64x8xf32> to vector<64xf32>
    %227 = vector.shape_cast %226 : vector<64xf32> to vector<64x1xf32>
    %228 = math.log %227 : vector<64x1xf32>
    %229 = arith.addf %222, %228 : vector<64x1xf32>
    %230 = vector.broadcast %220 : vector<64x1xi32> to vector<64x8xi32>
    %231 = arith.cmpi eq, %212, %230 : vector<64x8xi32>
    %cst_59 = arith.constant 0.000000e+00 : f32
    %232 = vector.broadcast %cst_59 : f32 to vector<64x8xf32>
    %233 = arith.select %231, %208, %232 : vector<64x8xi1>, vector<64x8xf32>
    %cst_60 = arith.constant dense<0.000000e+00> : vector<64xf32>
    %234 = vector.multi_reduction <add>, %233, %cst_60 [1] : vector<64x8xf32> to vector<64xf32>
    %235 = vector.shape_cast %234 : vector<64xf32> to vector<64x1xf32>
    %236 = arith.subf %235, %229 : vector<64x1xf32>
    %237 = arith.sitofp %220 : vector<64x1xi32> to vector<64x1xf32>
    %c0_61 = arith.constant 0 : index
    %c0_62 = arith.constant 0 : index
    %238 = vector.load %arg11[%c0_61, %c0_62] : memref<64x3xf32, #tpu.memory_space<vmem>>, vector<64x1xf32>
    tpu.vector_store %arg11[%c0_61, %c0_62], %237 {strides = array<i32>} : memref<64x3xf32, #tpu.memory_space<vmem>>, vector<64x1xf32>,
    %c0_63 = arith.constant 0 : index
    %c1_64 = arith.constant 1 : index
    %239 = vector.load %arg11[%c0_63, %c1_64] : memref<64x3xf32, #tpu.memory_space<vmem>>, vector<64x1xf32>
    tpu.vector_store %arg11[%c0_63, %c1_64], %209 {strides = array<i32>} : memref<64x3xf32, #tpu.memory_space<vmem>>, vector<64x1xf32>,
    %c0_65 = arith.constant 0 : index
    %c2 = arith.constant 2 : index
    %240 = vector.load %arg11[%c0_65, %c2] : memref<64x3xf32, #tpu.memory_space<vmem>>, vector<64x1xf32>
    tpu.vector_store %arg11[%c0_65, %c2], %236 {strides = array<i32>} : memref<64x3xf32, #tpu.memory_space<vmem>>, vector<64x1xf32>,
    return
  }
}

</mosaic_0001>

<bundles_post_ra>
// kernel: iam_lstm_policy_forward.1
= control target key start
LH: loop header
LB: loop body
LE: loop exit
PB: predicated region body
PF: predicated region fallthrough
CT: control target
= control target key end

     0   :  { %v2307_v3 = vmov 0.0   ;;  %vm64_vm0 = vcmask 130048   ;;  %v2308_v12 = vmov 0.0|0.0   ;;  %vm2309_vm1 = vmmov 0   ;;  %s2312_s29 = smov 32   ;;  %s3149_s1 = inlined_call_operand.vmem [shape: f32[16,160], index: 1, kind: input, shape index: {}]   ;;  %s3150_s3 = inlined_call_operand.vmem [shape: f32[32,128], index: 3, kind: input, shape index: {}]   ;;  %s3151_s0 = inlined_call_operand.vmem [shape: f32[64,16], index: 0, kind: input, shape index: {}]   ;;  %s3152_s9 = inlined_call_operand.vmem [shape: f32[2,8,32], index: 9, kind: input, shape index: {}, may-alias: {9,12}]   ;;  %s3153_s2 = inlined_call_operand.vmem [shape: f32[1,160], index: 2, kind: input, shape index: {}]   ;;  %s3154_s5 = inlined_call_operand.vmem [shape: f32[32,32], index: 5, kind: input, shape index: {}]   ;;  %s3155_s4 = inlined_call_operand.vmem [shape: f32[32,32], index: 4, kind: input, shape index: {}]   ;;  %s3156_s7 = inlined_call_operand.vmem [shape: f32[32,9], index: 7, kind: input, shape index: {}]   ;;  %s3157_s12 = inlined_call_operand.vmem [shape: f32[2,8,32], index: 12, kind: output, shape index: {1}, may-alias: {9,12}]   ;;  %s3158_s6 = inlined_call_operand.vmem [shape: f32[1,32], index: 6, kind: input, shape index: {}]   ;;  %s3159_s8 = inlined_call_operand.vmem [shape: f32[1,9], index: 8, kind: input, shape index: {}]   ;;  %s3160_s10 = inlined_call_operand.vmem [shape: f32[64,8], index: 10, kind: input, shape index: {}]   ;;  %s3161_s11 = inlined_call_operand.vmem [shape: f32[64,3], index: 11, kind: output, shape index: {0}]  }
   0x1   :  { %v49_v0 = vld [vmem:[%s3149_s1 + $0x8] sm:$0xff]  ;;  %v51_v1 = vld [vmem:[%s3149_s1 + $0x18] sm:$0xff]  ;;  %v48_v2 = vld [vmem:[%s3149_s1] sm:$0xff]  ;;  %189 = vmatprep.mubr.f32.mxu1 %v2307_v3  ;;  %153 = vmatprep.mubr.f32.mxu0 %v2307_v3  ;;  %vm216_vm2 = vcmask 261120   ;;  %v54_v18 = vlaneseq  ;;  %v2310_v31 = vmov 1.0   ;;  %vm1477_vm6 = vcmask 64512  }
   0x2   :  { %v2133_v4 = vpack.c.bf16 %v51_v1, %v49_v0  ;;  %v50_v5 = vld [vmem:[%s3149_s1 + $0x10] sm:$0xff]  ;;  %v202_v6 = vld [vmem:[%s3150_s3] sm:$0xff]  ;;  %v203_v8 = vld [vmem:[%s3150_s3 + $0x8] sm:$0xff] }
   0x3   :  { %v2135_v7 = vpack.c.bf16 %v50_v5, %v48_v2  ;;  %v46_v9 = vld [vmem:[%s3151_s0 + $0x30] sm:$0xff]  ;;  %v2403_v10 = vpack.c.bf16 %v203_v8, %v202_v6  ;;  %v40_v11 = vld [vmem:[%s3151_s0] sm:$0xff]  ;;  %v205_v14 = vld [vmem:[%s3150_s3 + $0x18] sm:$0xff]  ;;  %v2446_v19 = vshrl.u32 %v54_v18, 7  ;;  %v2448_v20 = vand.u32 127, %v54_v18 }
   0x4   :  { %2209 = vmatprep.subr.bf16.mxu1 %v2133_v4  ;;  %2134 = vmatprep.subr.bf16.mxu0 %v2133_v4  ;;  %v204_v13 = vld [vmem:[%s3150_s3 + $0x10] sm:$0xff]  ;;  %v47_v15 = vld [vmem:[%s3151_s0 + $0x38] sm:$0xff]  ;;  %v206_v17 = vld [vmem:[%s3152_s9] sm:$0xff] }
   0x5   :  { %2210 = vmatpush1.bf16.msra.mxu1 %v2135_v7  ;;  %2136 = vmatpush1.bf16.msra.mxu0 %v2135_v7  ;;  %v2423_v16 = vpack.c.bf16 %v205_v14, %v204_v13  ;;  %v56_v21 = vsub.s32 0, %v2446_v19  ;;  %v2454_v22 = vld [vmem:[%s3153_s2] sm:$0x3]  ;;  %vm211_vm3 = vcmp.ge.s32.totalorder %v2448_v20, 64  ;;  %vm212_vm4 = vcmp.lt.s32.totalorder %v2448_v20, 96  ;;  %s2311_s2 = smov 64  }
   0x6   :  { %2137 = vmatprep.subr.bf16.mxu1 %v2308_v12  ;;  %2161 = vmatprep.subr.bf16.mxu0 %v2308_v12  ;;  %vm213_vm5 = vmand %vm211_vm3, %vm212_vm4  ;;  %v1865_v44 = vld [vmem:[%s3152_s9 + $0x8] sm:$0xff]  ;;  %v42_v13 = vld [vmem:[%s3151_s0 + $0x10] sm:$0xff] }
   0x7   :  { %v2465_v27 = vrot.slane %v2454_v22, %v56_v21  ;;  %v2472_v32 = vsel %vm213_vm5, 2.0, %v2310_v31  ;;  %v2476_v41 = vsel %vm213_vm5, -1.0, %v2307_v3  ;;  %v41_v51 = vld [vmem:[%s3151_s0 + $0x8] sm:$0xff] }
   0x8   :  { %1863 = vmatmul.mubr.msk.f32.vlgmr.msra.gmra.mrb[0].mxu1 %vm64_vm0, %v46_v9  ;;  %1857 = vmatmul.mubr.msk.f32.vlgmr.msra.gmra.mrb[0].mxu0 %vm64_vm0, %v40_v11 }
   0x9   :  { %2139 = vmatpush3.bf16.msra.mxu1 %v2403_v10  ;;  %195 = vmatprep.mubr.f32.mxu1 %v2307_v3 }
   0xa   :  { %2140 = vmatprep.subr.bf16.mxu1 %v2308_v12  ;;  %159 = vmatprep.mubr.f32.mxu0 %v2307_v3 }
   0xb   :  { %2163 = vmatpush3.bf16.msra.mxu0 %v2403_v10 }
   0xc   :  { %1864 = vmatmul.mubr.msk.f32.gmra.mrb[2].mxu1 %vm64_vm0, %v47_v15  ;;  %2164 = vmatprep.subr.bf16.mxu0 %v2308_v12 }
   0xd   :  { %2142 = vmatpush3.bf16.msra.mxu1 %v2423_v16  ;;  %1993 = vmatprep.mubr.msk.f32.mxu1 %vm2309_vm1, %v2307_v3 }
   0xe   :  { %2143 = vmatprep.subr.bf16.mxu1 %v2308_v12  ;;  %1858 = vmatmul.mubr.msk.f32.gmra.mrb[2].mxu0 %vm64_vm0, %v41_v51 }
   0xf   :  { %2166 = vmatpush3.bf16.msra.mxu0 %v2423_v16  ;;  %165 = vmatprep.mubr.f32.mxu0 %v2307_v3 }
  0x10   :  { %1994 = vmatmul.mubr.msk.f32.vlgmr.msra.gmra.mrb[4].mxu1 %vm216_vm2, %v206_v17  ;;  %2173 = vmatprep.subr.bf16.mxu0 %v2308_v12 }
  0x11   :  { %2145 = vmatpush3.bf16.msra.mxu1 %v2403_v10  ;;  %2004 = vmatprep.mubr.msk.f32.mxu1 %vm2309_vm1, %v2307_v3 }
  0x12   :  { %2146 = vmatprep.subr.bf16.mxu1 %v2308_v12  ;;  %1859 = vmatmul.mubr.msk.f32.gmra.mrb[4].mxu0 %vm64_vm0, %v42_v13  ;;  %v45_v13 = vld [vmem:[%s3151_s0 + $0x28] sm:$0xff] }
  0x13   :  { %171 = vmatprep.mubr.f32.mxu0 %v2307_v3 }
  0x15   :  { %2148 = vmatpush3.bf16.msra.mxu1 %v2423_v16 }
  0x16   :  { %2149 = vmatprep.subr.bf16.mxu1 %v2308_v12 }
  0xdb   :  { %v2456_v23 = vpop.f32.mrb[0].mxu1  ;;  %v155_v24 = vpop.f32.mrb[0].mxu0 }
  0xdc   :  { %v2458_v25 = vpop.f32.mrb[1].mxu1  ;;  %v2460_v26 = vpop.f32.mrb[1].mxu0  ;;  %v156_v30 = vadd.f32 %v155_v24, %v2465_v27 }
  0xdf   :  { %v2467_v28 = vpop.f32.mrb[2].mxu1 }
  0xe0   :  { %v2469_v29 = vpop.f32.mrb[3].mxu1 }
  0xe1   :  { %v161_v55 = vpop.f32.mrb[2].mxu0 }
  0xe2   :  { %v2493_v56 = vpop.f32.mrb[3].mxu0  ;;  %v162_v58 = vadd.f32 %v161_v55, %v2465_v27 }
  0xe3   :  { %v286_v33 = vpop.f32.mrb[4].mxu1 }
  0xe4   :  { %v290_v34 = vadd.f32 %v286_v33, %v156_v30  ;;  %v1995_v35 = vpop.f32.mrb[5].mxu1 }
  0xe5   :  { %v167_v18 = vpop.f32.mrb[4].mxu0 }
  0xe6   :  { %v291_v36 = vmul.f32 %v290_v34, %v2472_v32  ;;  %v2518_v21 = vpop.f32.mrb[5].mxu0  ;;  %v168_v30 = vadd.f32 %v167_v18, %v2465_v27 }
  0xe8   :  { %v1867_v37 = vmul.f32 -1.442695, %v291_v36 }
  0xea   :  { %2227 = vpow2.f32 %v1867_v37 }
  0xf4   :  { %v2228_v38 = vpop.eup %2227 }
  0xf5   :  { %v295_v39 = vadd.f32 1.0, %v2228_v38 }
  0xf7   :  { %2229 = vrcp.f32 %v295_v39 }
 0x101   :  { %v2230_v40 = vpop.eup %2229 }
 0x102   :  { %v298_v42 = vmul.f32 %v2230_v40, %v2472_v32 }
 0x104   :  { %v299_v43 = vadd.f32 %v298_v42, %v2476_v41 }
 0x106   :  { %306 = vrot.lane.b32.xlu0 %v299_v43, %s2311_s2 }
 0x10a   :  { %301 = vrot.lane.b32.xlu0 %v1865_v44, %s2312_s29 }
 0x178   :  { %v307_v45 = vpop.permute.xlu0 %306 }
 0x179   :  { %v309_v46 = vmul.f32 %v307_v45, %v299_v43 }
 0x17b   :  { %311 = vrot.lane.b32.xlu1 %v309_v46, %s2312_s29 }
 0x17c   :  { %v302_v47 = vpop.permute.xlu0 %301 }
 0x17d   :  { %v304_v48 = vmul.f32 %v302_v47, %v299_v43 }
 0x1ed   :  { %v312_v49 = vpop.permute.xlu1 %311 }
 0x1ee   :  { %v314_v50 = vadd.f32 %v312_v49, %v304_v48  ;;  %v43_v48 = vld [vmem:[%s3151_s0 + $0x18] sm:$0xff] }
 0x1ef   :  { %1860 = vmatmul.mubr.msk.f32.gmra.mrb[6].mxu0 %vm64_vm0, %v43_v48 }
 0x1f0   :  { %2231 = vtanh.f32 %v314_v50  ;;  %177 = vmatprep.mubr.f32.mxu0 %v2307_v3 }
 0x1fa   :  { %v2232_v52 = vpop.eup %2231 }
 0x1fb   :  { %317 = vrot.lane.b32.xlu1 %v2232_v52, %s2311_s2 }
 0x26d   :  { %v318_v53 = vpop.permute.xlu1 %317 }
 0x26e   :  { %v320_v54 = vmul.f32 %v318_v53, %v299_v43 }
 0x270   :  { %322 = vrot.lane.b32.xlu0 %v320_v54, %s2312_s29 }
 0x2c2   :  { %v173_v52 = vpop.f32.mrb[6].mxu0 }
 0x2c3   :  { %v2543_v53 = vpop.f32.mrb[7].mxu0  ;;  %v174_v55 = vadd.f32 %v173_v52, %v2465_v27 }
 0x2e2   :  { %v2495_v57 = vpop.permute.xlu0 %322 }
 0x2e3   :  { %2005 = vmatmul.mubr.msk.f32.vlgmr.msra.gmra.mrb[6].mxu1 %vm216_vm2, %v2495_v57 }
 0x2e4   :  { %2151 = vmatpush3.bf16.msra.mxu1 %v2403_v10  ;;  %2015 = vmatprep.mubr.msk.f32.mxu1 %vm2309_vm1, %v2307_v3 }
 0x2e5   :  { %2152 = vmatprep.subr.bf16.mxu1 %v2308_v12 }
 0x2e8   :  { %2154 = vmatpush3.bf16.msra.mxu1 %v2423_v16 }
 0x2e9   :  { %2155 = vmatprep.subr.bf16.mxu1 %v2308_v12 }
 0x3b6   :  { %v392_v59 = vpop.f32.mrb[6].mxu1 }
 0x3b7   :  { %v396_v60 = vadd.f32 %v392_v59, %v162_v58  ;;  %v2006_v61 = vpop.f32.mrb[7].mxu1 }
 0x3b9   :  { %v397_v62 = vmul.f32 %v396_v60, %v2472_v32 }
 0x3bb   :  { %v1869_v63 = vmul.f32 -1.442695, %v397_v62 }
 0x3bd   :  { %2233 = vpow2.f32 %v1869_v63 }
 0x3c7   :  { %v2234_v0 = vpop.eup %2233 }
 0x3c8   :  { %v401_v1 = vadd.f32 1.0, %v2234_v0 }
 0x3ca   :  { %2235 = vrcp.f32 %v401_v1 }
 0x3d4   :  { %v2236_v2 = vpop.eup %2235 }
 0x3d5   :  { %v404_v4 = vmul.f32 %v2236_v2, %v2472_v32 }
 0x3d7   :  { %v405_v5 = vadd.f32 %v404_v4, %v2476_v41 }
 0x3d9   :  { %408 = vrot.lane.b32.xlu1 %v405_v5, %s2311_s2  ;;  %v406_v8 = vmul.f32 %v405_v5, %v314_v50 }
 0x44b   :  { %v409_v6 = vpop.permute.xlu1 %408 }
 0x44c   :  { %v411_v7 = vmul.f32 %v409_v6, %v405_v5 }
 0x44e   :  { %413 = vrot.lane.b32.xlu0 %v411_v7, %s2312_s29 }
 0x4c0   :  { %v414_v9 = vpop.permute.xlu0 %413 }
 0x4c1   :  { %v416_v11 = vadd.f32 %v414_v9, %v406_v8 }
 0x4c3   :  { %2237 = vtanh.f32 %v416_v11 }
 0x4cd   :  { %v2238_v14 = vpop.eup %2237 }
 0x4ce   :  { %419 = vrot.lane.b32.xlu1 %v2238_v14, %s2311_s2 }
 0x540   :  { %v420_v15 = vpop.permute.xlu1 %419 }
 0x541   :  { %v422_v17 = vmul.f32 %v420_v15, %v405_v5 }
 0x543   :  { %424 = vrot.lane.b32.xlu0 %v422_v17, %s2312_s29 }
 0x5b5   :  { %v2520_v24 = vpop.permute.xlu0 %424 }
 0x5b6   :  { %2016 = vmatmul.mubr.msk.f32.vlgmr.msra.gmra.mrb[8].mxu1 %vm216_vm2, %v2520_v24 }
 0x5b7   :  { %2157 = vmatpush3.bf16.msra.mxu1 %v2403_v10  ;;  %2026 = vmatprep.mubr.msk.f32.mxu1 %vm2309_vm1, %v2307_v3 }
 0x5b8   :  { %2158 = vmatprep.subr.bf16.mxu1 %v2308_v12 }
 0x5bb   :  { %2160 = vmatpush3.bf16.msra.mxu1 %v2423_v16 }
 0x5bc   :  { %2167 = vmatprep.subr.bf16.mxu1 %v2308_v12 }
 0x689   :  { %v494_v31 = vpop.f32.mrb[8].mxu1 }
 0x68a   :  { %v498_v33 = vadd.f32 %v494_v31, %v168_v30  ;;  %v2017_v34 = vpop.f32.mrb[9].mxu1 }
 0x68c   :  { %v499_v35 = vmul.f32 %v498_v33, %v2472_v32 }
 0x68e   :  { %v1871_v36 = vmul.f32 -1.442695, %v499_v35 }
 0x690   :  { %2239 = vpow2.f32 %v1871_v36 }
 0x69a   :  { %v2240_v37 = vpop.eup %2239 }
 0x69b   :  { %v503_v38 = vadd.f32 1.0, %v2240_v37 }
 0x69d   :  { %2241 = vrcp.f32 %v503_v38 }
 0x6a7   :  { %v2242_v39 = vpop.eup %2241 }
 0x6a8   :  { %v506_v40 = vmul.f32 %v2242_v39, %v2472_v32 }
 0x6aa   :  { %v507_v42 = vadd.f32 %v506_v40, %v2476_v41 }
 0x6ac   :  { %510 = vrot.lane.b32.xlu1 %v507_v42, %s2311_s2  ;;  %v508_v45 = vmul.f32 %v507_v42, %v416_v11  ;;  %v44_v11 = vld [vmem:[%s3151_s0 + $0x20] sm:$0xff] }
 0x6ad   :  { %1861 = vmatmul.mubr.msk.f32.gmra.mrb[8].mxu0 %vm64_vm0, %v44_v11  ;;  %v1059_v11 = vld [vmem:[%s3154_s5 + $0x8] sm:$0xff] }
 0x6ae   :  { %183 = vmatprep.mubr.f32.mxu0 %v2307_v3 }
 0x6b1   :  { %1862 = vmatmul.mubr.msk.f32.gmra.mrb[10].mxu0 %vm64_vm0, %v45_v13 }
 0x6b2   :  { %2037 = vmatprep.mubr.msk.f32.mxu0 %vm2309_vm1, %v2307_v3 }
 0x71e   :  { %v511_v43 = vpop.permute.xlu1 %510 }
 0x71f   :  { %v513_v44 = vmul.f32 %v511_v43, %v507_v42 }
 0x721   :  { %515 = vrot.lane.b32.xlu0 %v513_v44, %s2312_s29 }
 0x780   :  { %v179_v18 = vpop.f32.mrb[8].mxu0 }
 0x781   :  { %v2574_v30 = vpop.f32.mrb[9].mxu0  ;;  %v180_v35 = vadd.f32 %v179_v18, %v2465_v27  ;;  %v1060_v18 = vld [vmem:[%s3154_s5 + $0x10] sm:$0xff] }
 0x784   :  { %v185_v31 = vpop.f32.mrb[10].mxu0 }
 0x785   :  { %v2576_v33 = vpop.f32.mrb[11].mxu0 }
 0x793   :  { %v516_v46 = vpop.permute.xlu0 %515 }
 0x794   :  { %v518_v47 = vadd.f32 %v516_v46, %v508_v45 }
 0x796   :  { %2243 = vtanh.f32 %v518_v47 }
 0x7a0   :  { %v2244_v49 = vpop.eup %2243 }
 0x7a1   :  { %521 = vrot.lane.b32.xlu1 %v2244_v49, %s2311_s2 }
 0x813   :  { %v522_v50 = vpop.permute.xlu1 %521 }
 0x814   :  { %v524_v51 = vmul.f32 %v522_v50, %v507_v42 }
 0x816   :  { %526 = vrot.lane.b32.xlu0 %v524_v51, %s2312_s29 }
 0x888   :  { %v2545_v54 = vpop.permute.xlu0 %526 }
 0x889   :  { %2027 = vmatmul.mubr.msk.f32.vlgmr.msra.gmra.mrb[10].mxu1 %vm216_vm2, %v2545_v54 }
 0x88a   :  { %2169 = vmatpush3.bf16.msra.mxu1 %v2403_v10  ;;  %2048 = vmatprep.mubr.msk.f32.mxu1 %vm2309_vm1, %v2307_v3 }
 0x88b   :  { %2170 = vmatprep.subr.bf16.mxu1 %v2308_v12 }
 0x88e   :  { %2172 = vmatpush3.bf16.msra.mxu1 %v2423_v16 }
 0x88f   :  { %2179 = vmatprep.subr.bf16.mxu1 %v2308_v12 }
 0x95c   :  { %v596_v58 = vpop.f32.mrb[10].mxu1 }
 0x95d   :  { %v600_v59 = vadd.f32 %v596_v58, %v174_v55  ;;  %v2028_v60 = vpop.f32.mrb[11].mxu1 }
 0x95e   :  { %v186_v60 = vadd.f32 %v185_v31, %v2465_v27  ;;  %v1061_v31 = vld [vmem:[%s3154_s5 + $0x18] sm:$0xff] }
 0x95f   :  { %v601_v61 = vmul.f32 %v600_v59, %v2472_v32 }
 0x961   :  { %v1873_v62 = vmul.f32 -1.442695, %v601_v61 }
 0x963   :  { %2245 = vpow2.f32 %v1873_v62 }
 0x96d   :  { %v2246_v63 = vpop.eup %2245 }
 0x96e   :  { %v605_v0 = vadd.f32 1.0, %v2246_v63 }
 0x970   :  { %2247 = vrcp.f32 %v605_v0 }
 0x97a   :  { %v2248_v1 = vpop.eup %2247 }
 0x97b   :  { %v608_v2 = vmul.f32 %v2248_v1, %v2472_v32 }
 0x97d   :  { %v609_v4 = vadd.f32 %v608_v2, %v2476_v41 }
 0x97f   :  { %612 = vrot.lane.b32.xlu1 %v609_v4, %s2311_s2  ;;  %v610_v7 = vmul.f32 %v609_v4, %v518_v47 }
 0x9f1   :  { %v613_v5 = vpop.permute.xlu1 %612 }
 0x9f2   :  { %v615_v6 = vmul.f32 %v613_v5, %v609_v4 }
 0x9f4   :  { %617 = vrot.lane.b32.xlu0 %v615_v6, %s2312_s29 }
 0xa66   :  { %v618_v8 = vpop.permute.xlu0 %617 }
 0xa67   :  { %v620_v9 = vadd.f32 %v618_v8, %v610_v7 }
 0xa69   :  { %2249 = vtanh.f32 %v620_v9 }
 0xa73   :  { %v2250_v14 = vpop.eup %2249 }
 0xa74   :  { %623 = vrot.lane.b32.xlu1 %v2250_v14, %s2311_s2 }
 0xae6   :  { %v624_v15 = vpop.permute.xlu1 %623 }
 0xae7   :  { %v626_v17 = vmul.f32 %v624_v15, %v609_v4 }
 0xae9   :  { %628 = vrot.lane.b32.xlu0 %v626_v17, %s2312_s29 }
 0xb5b   :  { %v2578_v34 = vpop.permute.xlu0 %628 }
 0xb5c   :  { %2038 = vmatmul.mubr.msk.f32.vlgmr.msra.gmra.mrb[12].mxu0 %vm216_vm2, %v2578_v34 }
 0xb5d   :  { %2175 = vmatpush3.bf16.msra.mxu0 %v2403_v10  ;;  %2059 = vmatprep.mubr.msk.f32.mxu0 %vm2309_vm1, %v2307_v3 }
 0xb5e   :  { %2176 = vmatprep.subr.bf16.mxu0 %v2308_v12 }
 0xb61   :  { %2178 = vmatpush3.bf16.msra.mxu0 %v2423_v16 }
 0xc2f   :  { %v698_v36 = vpop.f32.mrb[12].mxu0 }
 0xc30   :  { %v702_v37 = vadd.f32 %v698_v36, %v180_v35  ;;  %v2039_v38 = vpop.f32.mrb[13].mxu0  ;;  %v2189_v35 = vpack.c.bf16 %v1061_v31, %v1060_v18 }
 0xc32   :  { %v703_v39 = vmul.f32 %v702_v37, %v2472_v32  ;;  %v192_v37 = vadd.f32 %v2456_v23, %v2465_v27 }
 0xc34   :  { %v1875_v40 = vmul.f32 -1.442695, %v703_v39 }
 0xc36   :  { %2251 = vpow2.f32 %v1875_v40 }
 0xc40   :  { %v2252_v42 = vpop.eup %2251 }
 0xc41   :  { %v707_v43 = vadd.f32 1.0, %v2252_v42 }
 0xc43   :  { %2253 = vrcp.f32 %v707_v43 }
 0xc4d   :  { %v2254_v44 = vpop.eup %2253 }
 0xc4e   :  { %v710_v45 = vmul.f32 %v2254_v44, %v2472_v32 }
 0xc50   :  { %v711_v46 = vadd.f32 %v710_v45, %v2476_v41 }
 0xc52   :  { %714 = vrot.lane.b32.xlu1 %v711_v46, %s2311_s2  ;;  %v712_v49 = vmul.f32 %v711_v46, %v620_v9  ;;  %v1058_v9 = vld [vmem:[%s3154_s5] sm:$0xff] }
 0xc53   :  { %v2185_v13 = vpack.c.bf16 %v1059_v11, %v1058_v9 }
 0xc55   :  { %2186 = vmatprep.subr.bf16.mxu0 %v2185_v13 }
 0xcc4   :  { %v715_v47 = vpop.permute.xlu1 %714 }
 0xcc5   :  { %v717_v48 = vmul.f32 %v715_v47, %v711_v46 }
 0xcc7   :  { %719 = vrot.lane.b32.xlu0 %v717_v48, %s2312_s29 }
 0xd39   :  { %v720_v50 = vpop.permute.xlu0 %719 }
 0xd3a   :  { %v722_v51 = vadd.f32 %v720_v50, %v712_v49 }
 0xd3c   :  { %2255 = vtanh.f32 %v722_v51 }
 0xd46   :  { %v2256_v52 = vpop.eup %2255 }
 0xd47   :  { %725 = vrot.lane.b32.xlu1 %v2256_v52, %s2311_s2 }
 0xdb9   :  { %v726_v55 = vpop.permute.xlu1 %725 }
 0xdba   :  { %v728_v58 = vmul.f32 %v726_v55, %v711_v46  ;;  %v198_v55 = vadd.f32 %v2467_v28, %v2465_v27 }
 0xdbc   :  { %730 = vrot.lane.b32.xlu0 %v728_v58, %s2312_s29 }
 0xe2e   :  { %v731_v59 = vpop.permute.xlu0 %730 }
 0xe2f   :  { %2049 = vmatmul.mubr.msk.f32.vlgmr.msra.gmra.mrb[12].mxu1 %vm216_vm2, %v731_v59 }
 0xe30   :  { %2181 = vmatpush3.bf16.msra.mxu1 %v2403_v10  ;;  %2070 = vmatprep.mubr.msk.f32.mxu1 %vm2309_vm1, %v2307_v3 }
 0xe31   :  { %2182 = vmatprep.subr.bf16.mxu1 %v2308_v12 }
 0xe34   :  { %2184 = vmatpush3.bf16.msra.mxu1 %v2423_v16 }
 0xf02   :  { %v800_v61 = vpop.f32.mrb[12].mxu1 }
 0xf03   :  { %v804_v62 = vadd.f32 %v800_v61, %v186_v60  ;;  %v2050_v63 = vpop.f32.mrb[13].mxu1 }
 0xf05   :  { %v805_v0 = vmul.f32 %v804_v62, %v2472_v32 }
 0xf07   :  { %v1877_v1 = vmul.f32 -1.442695, %v805_v0 }
 0xf09   :  { %2257 = vpow2.f32 %v1877_v1 }
 0xf13   :  { %v2258_v2 = vpop.eup %2257 }
 0xf14   :  { %v809_v4 = vadd.f32 1.0, %v2258_v2 }
 0xf16   :  { %2259 = vrcp.f32 %v809_v4 }
 0xf20   :  { %v2260_v10 = vpop.eup %2259 }
 0xf21   :  { %v812_v5 = vmul.f32 %v2260_v10, %v2472_v32 }
 0xf23   :  { %v813_v3 = vadd.f32 %v812_v5, %v2476_v41 }
 0xf25   :  { %816 = vrot.lane.b32.xlu1 %v813_v3, %s2311_s2  ;;  %v814_v6 = vmul.f32 %v813_v3, %v722_v51 }
 0xf97   :  { %v817_v12 = vpop.permute.xlu1 %816 }
 0xf98   :  { %v819_v16 = vmul.f32 %v817_v12, %v813_v3  ;;  %v1054_v12 = vld [vmem:[%s3155_s4] sm:$0xff] }
 0xf9a   :  { %821 = vrot.lane.b32.xlu0 %v819_v16, %s2312_s29 }
0x100c   :  { %v822_v7 = vpop.permute.xlu0 %821 }
0x100d   :  { %v824_v8 = vadd.f32 %v822_v7, %v814_v6  ;;  %v1057_v6 = vld [vmem:[%s3155_s4 + $0x18] sm:$0xff] }
0x100f   :  { %2261 = vtanh.f32 %v824_v8 }
0x1019   :  { %v2262_v14 = vpop.eup %2261 }
0x101a   :  { %827 = vrot.lane.b32.xlu1 %v2262_v14, %s2311_s2  ;;  %v1322_v14 = vld [vmem:[%s3156_s7 + $0x8] sm:$0xff] }
0x108c   :  { %v828_v15 = vpop.permute.xlu1 %827 }
0x108d   :  { %v830_v17 = vmul.f32 %v828_v15, %v813_v3 }
0x108f   :  { %832 = vrot.lane.b32.xlu0 %v830_v17, %s2312_s29  ;;  %v60_v17 = vsub.s32 1, %v2446_v19 }
0x1091   :  { %v61_v18 = vrot.slane %v2454_v22, %v60_v17 }
0x1093   :  { %v158_v31 = vadd.f32 %v2460_v26, %v61_v18  ;;  %v176_v22 = vadd.f32 %v2543_v53, %v61_v18  ;;  %v182_v26 = vadd.f32 %v2574_v30, %v61_v18 }
0x1101   :  { %v833_v36 = vpop.permute.xlu0 %832 }
0x1102   :  { %2060 = vmatmul.mubr.msk.f32.vlgmr.msra.gmra.mrb[14].mxu0 %vm216_vm2, %v833_v36 }
0x1103   :  { %2188 = vmatpush3.bf16.msra.mxu0 %v2185_v13  ;;  %2081 = vmatprep.mubr.msk.f32.mxu0 %vm216_vm2, %v2495_v57  ;;  %v1321_v13 = vld [vmem:[%s3156_s7] sm:$0xff] }
0x1104   :  { %2190 = vmatprep.subr.bf16.mxu0 %v2189_v35  ;;  %v2201_v15 = vpack.c.bf16 %v1322_v14, %v1321_v13 }
0x1106   :  { %2202 = vmatprep.subr.bf16.mxu1 %v2201_v15 }
0x1107   :  { %2192 = vmatpush3.bf16.msra.mxu0 %v2189_v35  ;;  %v164_v35 = vadd.f32 %v2493_v56, %v61_v18  ;;  %v1049_v56 = vmax.f32 %v176_v22, 0.0 }
0x1109   :  { %v1047_v19 = vmax.f32 %v164_v35, 0.0  ;;  %v1464_v35 = vld [vmem:[%s3160_s10 + $0x18] sm:$0xff] }
0x110a   :  { %2082 = vmatmul.mubr.msk.f32.vlgmr.msra.gmra.mrb[16].mxu0 %vm216_vm2, %v2520_v24 }
0x110b   :  { %2084 = vmatprep.mubr.msk.f32.mxu0 %vm216_vm2, %v2545_v54 }
0x110e   :  { %2085 = vmatmul.mubr.msk.f32.gmra.mrb[18].mxu0 %vm216_vm2, %v2578_v34 }
0x110f   :  { %2087 = vmatprep.mubr.msk.f32.mxu0 %vm216_vm2, %v731_v59 }
0x1112   :  { %2088 = vmatmul.mubr.msk.f32.gmra.mrb[20].mxu0 %vm216_vm2, %v833_v36  ;;  %v1046_v36 = vmax.f32 %v158_v31, 0.0 }
0x11d5   :  { %v902_v38 = vpop.f32.mrb[14].mxu0 }
0x11d6   :  { %v906_v57 = vadd.f32 %v902_v38, %v192_v37  ;;  %v2061_v39 = vpop.f32.mrb[15].mxu0  ;;  %v170_v37 = vadd.f32 %v2518_v21, %v61_v18  ;;  %v188_v21 = vadd.f32 %v2576_v33, %v61_v18  ;;  %v1324_v33 = vld [vmem:[%s3156_s7 + $0x18] sm:$0xff] }
0x11d7   :  { %v194_v39 = vadd.f32 %v2458_v25, %v61_v18  ;;  %v1323_v25 = vld [vmem:[%s3156_s7 + $0x10] sm:$0xff] }
0x11d8   :  { %v907_v40 = vmul.f32 %v906_v57, %v2472_v32  ;;  %v1048_v57 = vmax.f32 %v170_v37, 0.0  ;;  %v1051_v53 = vmax.f32 %v188_v21, 0.0  ;;  %v1463_v37 = vld [vmem:[%s3160_s10 + $0x10] sm:$0xff] }
0x11da   :  { %v1879_v42 = vmul.f32 -1.442695, %v907_v40  ;;  %v1050_v40 = vmax.f32 %v182_v26, 0.0 }
0x11dc   :  { %2263 = vpow2.f32 %v1879_v42  ;;  %v200_v42 = vadd.f32 %v2469_v29, %v61_v18  ;;  %v1899_v29 = vld [vmem:[%s3158_s6] ss:$0 sm:$0xff] }
0x11de   :  { %v1053_v30 = vmax.f32 %v200_v42, 0.0  ;;  %v1465_v42 = vld [vmem:[%s3160_s10 + $0x20] sm:$0xff] }
0x11e6   :  { %v2264_v24 = vpop.eup %2263 }
0x11e7   :  { %v911_v43 = vadd.f32 1.0, %v2264_v24  ;;  %v1052_v24 = vmax.f32 %v194_v39, 0.0  ;;  %v1466_v39 = vld [vmem:[%s3160_s10 + $0x28] sm:$0xff] }
0x11e9   :  { %2265 = vrcp.f32 %v911_v43  ;;  %v2205_v43 = vpack.c.bf16 %v1324_v33, %v1323_v25 }
0x11f3   :  { %v2266_v54 = vpop.eup %2265 }
0x11f4   :  { %v914_v34 = vmul.f32 %v2266_v54, %v2472_v32 }
0x11f6   :  { %v915_v44 = vadd.f32 %v914_v34, %v2476_v41 }
0x11f8   :  { %918 = vrot.lane.b32.xlu1 %v915_v44, %s2311_s2  ;;  %v916_v23 = vmul.f32 %v915_v44, %v824_v8 }
0x126a   :  { %v919_v45 = vpop.permute.xlu1 %918 }
0x126b   :  { %v921_v46 = vmul.f32 %v919_v45, %v915_v44 }
0x126d   :  { %923 = vrot.lane.b32.xlu0 %v921_v46, %s2312_s29 }
0x12df   :  { %v924_v47 = vpop.permute.xlu0 %923 }
0x12e0   :  { %v926_v48 = vadd.f32 %v924_v47, %v916_v23 }
0x12e2   :  { %2267 = vtanh.f32 %v926_v48 }
0x12ec   :  { %v2268_v49 = vpop.eup %2267 }
0x12ed   :  { %929 = vrot.lane.b32.xlu1 %v2268_v49, %s2311_s2 }
0x135f   :  { %v930_v50 = vpop.permute.xlu1 %929 }
0x1360   :  { %v932_v51 = vmul.f32 %v930_v50, %v915_v44 }
0x1362   :  { %934 = vrot.lane.b32.xlu0 %v932_v51, %s2312_s29 }
0x13d4   :  { %v935_v52 = vpop.permute.xlu0 %934 }
0x13d5   :  { %2071 = vmatmul.mubr.msk.f32.vlgmr.msra.gmra.mrb[14].mxu1 %vm216_vm2, %v935_v52  ;;  %2090 = vmatprep.mubr.msk.f32.mxu0 %vm216_vm2, %v935_v52 }
0x13d6   :  { %2204 = vmatpush3.bf16.msra.mxu1 %v2201_v15 }
0x13d7   :  { %2206 = vmatprep.subr.bf16.mxu1 %v2205_v43 }
0x13da   :  { %2208 = vmatpush3.bf16.msra.mxu1 %v2205_v43 }
0x14a8   :  { %v1004_v58 = vpop.f32.mrb[14].mxu1 }
0x14a9   :  { %v1008_v59 = vadd.f32 %v1004_v58, %v198_v55  ;;  %v2072_v60 = vpop.f32.mrb[15].mxu1 }
0x14ab   :  { %v1009_v61 = vmul.f32 %v1008_v59, %v2472_v32 }
0x14ad   :  { %v1881_v62 = vmul.f32 -1.442695, %v1009_v61 }
0x14af   :  { %2269 = vpow2.f32 %v1881_v62 }
0x14b9   :  { %v2270_v63 = vpop.eup %2269 }
0x14ba   :  { %v1013_v0 = vadd.f32 1.0, %v2270_v63 }
0x14bc   :  { %2271 = vrcp.f32 %v1013_v0 }
0x14c6   :  { %v2272_v1 = vpop.eup %2271 }
0x14c7   :  { %v1016_v2 = vmul.f32 %v2272_v1, %v2472_v32  ;;  %v1055_v32 = vld [vmem:[%s3155_s4 + $0x8] sm:$0xff] }
0x14c8   :  { %v2193_v16 = vpack.c.bf16 %v1055_v32, %v1054_v12  ;;  %v1461_v32 = vld [vmem:[%s3160_s10] sm:$0xff] }
0x14c9   :  { %v1017_v4 = vadd.f32 %v1016_v2, %v2476_v41  ;;  %v1056_v41 = vld [vmem:[%s3155_s4 + $0x10] sm:$0xff]  ;;  %s2314_s4 = smov 96  }
0x14ca   :  { %v2197_v7 = vpack.c.bf16 %v1057_v6, %v1056_v41  ;;  %2194 = vmatprep.subr.bf16.mxu0 %v2193_v16  ;;  %v1462_v41 = vld [vmem:[%s3160_s10 + $0x8] sm:$0xff] }
0x14cb   :  { %1020 = vrot.lane.b32.xlu1 %v1017_v4, %s2311_s2  ;;  %v1018_v27 = vmul.f32 %v1017_v4, %v926_v48  ;;  %2196 = vmatpush3.bf16.msra.mxu0 %v2193_v16 }
0x14cc   :  { %2198 = vmatprep.subr.bf16.mxu0 %v2197_v7 }
0x14cf   :  { %2200 = vmatpush3.bf16.msra.mxu0 %v2197_v7 }
0x153d   :  { %v1021_v10 = vpop.permute.xlu1 %1020 }
0x153e   :  { %v1023_v5 = vmul.f32 %v1021_v10, %v1017_v4 }
0x1540   :  { %1025 = vrot.lane.b32.xlu0 %v1023_v5, %s2312_s29  ;;  %v1900_v5 = vld [vmem:[%s3159_s8] ss:$0 sm:$0xff] }
0x15b2   :  { %v1026_v28 = vpop.permute.xlu0 %1025 }
0x15b3   :  { %v2650_v3 = vadd.f32 %v1026_v28, %v1018_v27 }
0x15b5   :  { %2273 = vtanh.f32 %v2650_v3 }
0x15bf   :  { %v2274_v8 = vpop.eup %2273 }
0x15c0   :  { %1031 = vrot.lane.b32.xlu1 %v2274_v8, %s2311_s2 }
0x1632   :  { %v1032_v9 = vpop.permute.xlu1 %1031 }
0x1633   :  { %v1034_v11 = vmul.f32 %v1032_v9, %v1017_v4 }
0x1635   :  { %1036 = vrot.lane.b32.xlu0 %v1034_v11, %s2312_s29 }
0x16a7   :  { %v1037_v38 = vpop.permute.xlu0 %1036 }
0x16a8   :  { %1039 = vst.msk [vmem:[%s3157_s12] sm:$0xff] %vm216_vm2, %v1037_v38  ;;  %2091 = vmatmul.mubr.msk.f32.gmra.mrb[22].mxu0 %vm216_vm2, %v1037_v38 }
0x16a9   :  { %2101 = vmatprep.mubr.msk.f32.mxu0 %vm216_vm2, %v1046_v36 }
0x16ac   :  { %2102 = vmatmul.mubr.msk.f32.vlgmr.msra.gmra.mrb[16].mxu0 %vm216_vm2, %v1047_v19 }
0x16ad   :  { %2104 = vmatprep.mubr.msk.f32.mxu0 %vm216_vm2, %v1048_v57 }
0x16b0   :  { %2105 = vmatmul.mubr.msk.f32.gmra.mrb[18].mxu0 %vm216_vm2, %v1049_v56 }
0x16b1   :  { %2107 = vmatprep.mubr.msk.f32.mxu0 %vm216_vm2, %v1050_v40 }
0x16b4   :  { %2108 = vmatmul.mubr.msk.f32.gmra.mrb[20].mxu0 %vm216_vm2, %v1051_v53 }
0x16b5   :  { %2110 = vmatprep.mubr.msk.f32.mxu0 %vm216_vm2, %v1052_v24 }
0x16b8   :  { %2111 = vmatmul.mubr.msk.f32.gmra.mrb[22].mxu0 %vm216_vm2, %v1053_v30 }
0x177f   :  { %v2103_v54 = vpop.f32.mrb[16].mxu0 }
0x1780   :  { %v1306_v34 = vadd.f32 %v2103_v54, %v1899_v29  ;;  %v1259_v44 = vpop.f32.mrb[17].mxu0  ;;  %v1467_v54 = vld [vmem:[%s3160_s10 + $0x30] sm:$0xff] }
0x1781   :  { %v1305_v45 = vadd.f32 %v1899_v29, %v1259_v44 }
0x1782   :  { %v1314_v47 = vmax.f32 %v1306_v34, 0.0 }
0x1783   :  { %v1313_v46 = vmax.f32 %v1305_v45, 0.0  ;;  %v2106_v23 = vpop.f32.mrb[18].mxu0 }
0x1784   :  { %v1308_v48 = vadd.f32 %v2106_v23, %v1899_v29  ;;  %v1269_v49 = vpop.f32.mrb[19].mxu0 }
0x1785   :  { %v1307_v50 = vadd.f32 %v1899_v29, %v1269_v49  ;;  %2121 = vmatprep.mubr.msk.f32.mxu1 %vm216_vm2, %v1313_v46 }
0x1786   :  { %2122 = vmatmul.mubr.msk.f32.vlgmr.msra.gmra.mrb[16].mxu1 %vm216_vm2, %v1314_v47  ;;  %v1316_v55 = vmax.f32 %v1308_v48, 0.0 }
0x1787   :  { %v1315_v51 = vmax.f32 %v1307_v50, 0.0  ;;  %v2109_v52 = vpop.f32.mrb[20].mxu0 }
0x1788   :  { %v1310_v58 = vadd.f32 %v2109_v52, %v1899_v29  ;;  %v1279_v59 = vpop.f32.mrb[21].mxu0 }
0x1789   :  { %v1309_v60 = vadd.f32 %v1899_v29, %v1279_v59  ;;  %2124 = vmatprep.mubr.msk.f32.mxu1 %vm216_vm2, %v1315_v51 }
0x178a   :  { %2125 = vmatmul.mubr.msk.f32.gmra.mrb[18].mxu1 %vm216_vm2, %v1316_v55  ;;  %v1318_v63 = vmax.f32 %v1310_v58, 0.0 }
0x178b   :  { %v1317_v61 = vmax.f32 %v1309_v60, 0.0  ;;  %v2112_v62 = vpop.f32.mrb[22].mxu0 }
0x178c   :  { %v1312_v0 = vadd.f32 %v2112_v62, %v1899_v29  ;;  %v1289_v1 = vpop.f32.mrb[23].mxu0 }
0x178d   :  { %v1311_v2 = vadd.f32 %v1899_v29, %v1289_v1  ;;  %2127 = vmatprep.mubr.msk.f32.mxu1 %vm216_vm2, %v1317_v61  ;;  %v1468_v29 = vld [vmem:[%s3160_s10 + $0x38] sm:$0xff]  ;;  %s2313_s10 = smov 121  }
0x178e   :  { %2128 = vmatmul.mubr.msk.f32.gmra.mrb[20].mxu1 %vm216_vm2, %v1318_v63  ;;  %v1320_v10 = vmax.f32 %v1312_v0, 0.0 }
0x178f   :  { %v1319_v4 = vmax.f32 %v1311_v2, 0.0 }
0x1791   :  { %2130 = vmatprep.mubr.msk.f32.mxu1 %vm216_vm2, %v1319_v4 }
0x1792   :  { %2131 = vmatmul.mubr.msk.f32.gmra.mrb[22].mxu1 %vm216_vm2, %v1320_v10 }
0x1859   :  { %v2123_v27 = vpop.f32.mrb[16].mxu1 }
0x185a   :  { %v2716_v28 = vadd.f32 %v2123_v27, %v1900_v5  ;;  %v1422_v12 = vpop.f32.mrb[17].mxu1 }
0x185b   :  { %v2724_v16 = vadd.f32 %v1900_v5, %v1422_v12 }
0x185c   :  { %v1641_v6 = vsel %vm1477_vm6, %v2716_v28, -inf  ;;  %v2734_v11 = vadd.f32 %v1462_v41, %v2716_v28 }
0x185d   :  { %1642 = vmax.xlane.f32.xlu1 %v1641_v6  ;;  %v2126_v7 = vpop.f32.mrb[18].mxu1  ;;  %v1638_v8 = vsel %vm1477_vm6, %v2724_v16, -inf  ;;  %v2731_v9 = vadd.f32 %v1461_v32, %v2724_v16 }
0x185e   :  { %v1432_v13 = vpop.f32.mrb[19].mxu1  ;;  %1639 = vmax.xlane.f32.xlu0 %v1638_v8  ;;  %v2738_v15 = vadd.f32 %v2126_v7, %v1900_v5  ;;  %v1481_v31 = vsel %vm1477_vm6, %v2734_v11, -inf }
0x185f   :  { %v1478_v14 = vsel %vm1477_vm6, %v2731_v9, -inf  ;;  %v2740_v17 = vadd.f32 %v1900_v5, %v1432_v13 }
0x1860   :  { %v1647_v19 = vsel %vm1477_vm6, %v2738_v15, -inf  ;;  %v2755_v22 = vadd.f32 %v1464_v35, %v2738_v15 }
0x1861   :  { %v2129_v18 = vpop.f32.mrb[20].mxu1  ;;  %1479 = vmax.xlane.f32.xlu1 %v1478_v14  ;;  %v1644_v56 = vsel %vm1477_vm6, %v2740_v17, -inf  ;;  %v2762_v21 = vadd.f32 %v1463_v37, %v2740_v17 }
0x1862   :  { %v1442_v36 = vpop.f32.mrb[21].mxu1  ;;  %1482 = vmax.xlane.f32.xlu0 %v1481_v31  ;;  %v2750_v38 = vadd.f32 %v2129_v18, %v1900_v5  ;;  %v1487_v24 = vsel %vm1477_vm6, %v2755_v22, -inf }
0x1863   :  { %v2757_v57 = vadd.f32 %v1900_v5, %v1442_v36  ;;  %v1484_v33 = vsel %vm1477_vm6, %v2762_v21, -inf }
0x1864   :  { %v2775_v30 = vadd.f32 %v1466_v39, %v2750_v38  ;;  %v1653_v48 = vsel %vm1477_vm6, %v2750_v38, -inf }
0x1865   :  { %v2132_v26 = vpop.f32.mrb[22].mxu1  ;;  %1648 = vmax.xlane.f32.xlu1 %v1647_v19  ;;  %v2782_v43 = vadd.f32 %v1465_v42, %v2757_v57  ;;  %v1650_v49 = vsel %vm1477_vm6, %v2757_v57, -inf }
0x1866   :  { %v1452_v40 = vpop.f32.mrb[23].mxu1  ;;  %1645 = vmax.xlane.f32.xlu0 %v1644_v56  ;;  %v2770_v53 = vadd.f32 %v2132_v26, %v1900_v5  ;;  %v1493_v34 = vsel %vm1477_vm6, %v2775_v30, -inf }
0x1867   :  { %v2777_v25 = vadd.f32 %v1900_v5, %v1452_v40  ;;  %v1490_v45 = vsel %vm1477_vm6, %v2782_v43, -inf }
0x1868   :  { %v2793_v44 = vadd.f32 %v1468_v29, %v2770_v53  ;;  %v1659_v50 = vsel %vm1477_vm6, %v2770_v53, -inf }
0x1869   :  { %1488 = vmax.xlane.f32.xlu1 %v1487_v24  ;;  %v2798_v46 = vadd.f32 %v1467_v54, %v2777_v25  ;;  %v1656_v51 = vsel %vm1477_vm6, %v2777_v25, -inf }
0x186a   :  { %1485 = vmax.xlane.f32.xlu0 %v1484_v33  ;;  %v1499_v23 = vsel %vm1477_vm6, %v2793_v44, -inf }
0x186b   :  { %v1496_v47 = vsel %vm1477_vm6, %v2798_v46, -inf }
0x186d   :  { %1494 = vmax.xlane.f32.xlu1 %v1493_v34 }
0x186e   :  { %1491 = vmax.xlane.f32.xlu0 %v1490_v45 }
0x1871   :  { %1500 = vmax.xlane.f32.xlu1 %v1499_v23 }
0x1872   :  { %1497 = vmax.xlane.f32.xlu0 %v1496_v47 }
0x1875   :  { %1654 = vmax.xlane.f32.xlu1 %v1653_v48 }
0x1876   :  { %1651 = vmax.xlane.f32.xlu0 %v1650_v49 }
0x1879   :  { %1660 = vmax.xlane.f32.xlu1 %v1659_v50 }
0x187a   :  { %1657 = vmax.xlane.f32.xlu0 %v1656_v51 }
0x188a   :  { %1809 = vrot.lane.b32.xlu1 %v2716_v28, %s2313_s10 }
0x188e   :  { %1811 = vrot.lane.b32.xlu1 %v2740_v17, %s2313_s10 }
0x1890   :  { %1807 = vrot.lane.b32.xlu0 %v2724_v16, %s2313_s10 }
0x18ea   :  { %v2818_v52 = vpop.xlane.xlu1 %1642 }
0x18eb   :  { %v2820_v55 = vpop.xlane.xlu0 %1639  ;;  %v1663_v58 = vsub.f32 %v2716_v28, %v2818_v52 }
0x18ec   :  { %v1662_v59 = vsub.f32 %v2724_v16, %v2820_v55 }
0x18ed   :  { %v1672_v62 = vmul.f32 1.442695, %v1663_v58 }
0x18ee   :  { %v1480_v60 = vpop.xlane.xlu1 %1479  ;;  %v1670_v0 = vmul.f32 1.442695, %v1662_v59 }
0x18ef   :  { %vm1502_vm7 = vcmp.eq.f32.partialorder %v2731_v9, %v1480_v60  ;;  %v1483_v61 = vpop.xlane.xlu0 %1482  ;;  %2275 = vpow2.f32 %v1672_v62 }
0x18f0   :  { %v1510_v63 = vsel %vm1502_vm7, %v2448_v20, 8  ;;  %vm1503_vm8 = vcmp.eq.f32.partialorder %v2734_v11, %v1483_v61  ;;  %2277 = vpow2.f32 %v1670_v0 }
0x18f1   :  { %v2830_v1 = vsel %vm1477_vm6, %v1510_v63, 2147483647  ;;  %v1511_v2 = vsel %vm1503_vm8, %v2448_v20, 8 }
0x18f2   :  { %v2834_v4 = vsel %vm1477_vm6, %v1511_v2, 2147483647  ;;  %v2836_v10 = vpop.xlane.xlu1 %1648  ;;  %v1520_v5 = vshra.s32 %v2830_v1, 16 }
0x18f3   :  { %v2839_v27 = vpop.xlane.xlu0 %1645  ;;  %v1535_v12 = vshra.s32 %v2834_v4, 16  ;;  %v1665_v32 = vsub.f32 %v2738_v15, %v2836_v10 }
0x18f4   :  { %v2844_v41 = vcvt.s32.f32 %v1520_v5  ;;  %v1664_v6 = vsub.f32 %v2740_v17, %v2839_v27 }
0x18f5   :  { %v2848_v7 = vcvt.s32.f32 %v1535_v12  ;;  %v1676_v11 = vmul.f32 1.442695, %v1665_v32 }
0x18f6   :  { %1523 = vmin.xlane.f32.xlu0 %v2844_v41  ;;  %v1489_v8 = vpop.xlane.xlu1 %1488  ;;  %v1674_v14 = vmul.f32 1.442695, %v1664_v6 }
0x18f7   :  { %vm1505_vm9 = vcmp.eq.f32.partialorder %v2755_v22, %v1489_v8  ;;  %v1486_v9 = vpop.xlane.xlu0 %1485  ;;  %1538 = vmin.xlane.f32.xlu1 %v2848_v7  ;;  %2279 = vpow2.f32 %v1676_v11 }
0x18f8   :  { %v1513_v13 = vsel %vm1505_vm9, %v2448_v20, 8  ;;  %vm1504_vm10 = vcmp.eq.f32.partialorder %v2762_v21, %v1486_v9  ;;  %2281 = vpow2.f32 %v1674_v14  ;;  %vm1790_vm9 = vcmask 7168  }
0x18f9   :  { %v2856_v18 = vsel %vm1477_vm6, %v1513_v13, 2147483647  ;;  %v1512_v31 = vsel %vm1504_vm10, %v2448_v20, 8  ;;  %v2276_v42 = vpop.eup %2275 }
0x18fa   :  { %v2860_v35 = vsel %vm1477_vm6, %v1512_v31, 2147483647  ;;  %v1495_v36 = vpop.xlane.xlu1 %1494  ;;  %v1565_v37 = vshra.s32 %v2856_v18, 16  ;;  %v2278_v33 = vpop.eup %2277  ;;  %v1689_v54 = vsel %vm1477_vm6, %v2276_v42, 0.0 }
0x18fb   :  { %vm1507_vm11 = vcmp.eq.f32.partialorder %v2775_v30, %v1495_v36  ;;  %v1492_v19 = vpop.xlane.xlu0 %1491  ;;  %v1550_v22 = vshra.s32 %v2860_v35, 16  ;;  %v1686_v23 = vsel %vm1477_vm6, %v2278_v33, 0.0 }
0x18fc   :  { %v1515_v26 = vsel %vm1507_vm11, %v2448_v20, 8  ;;  %vm1506_vm12 = vcmp.eq.f32.partialorder %v2782_v43, %v1492_v19  ;;  %v2867_v56 = vcvt.s32.f32 %v1565_v37  ;;  %vm1831_vm11 = vcmask 15368  }
0x18fd   :  { %v2870_v21 = vsel %vm1477_vm6, %v1515_v26, 2147483647  ;;  %v1514_v39 = vsel %vm1506_vm12, %v2448_v20, 8  ;;  %v2873_v40 = vcvt.s32.f32 %v1550_v22 }
0x18fe   :  { %v2876_v24 = vsel %vm1477_vm6, %v1514_v39, 2147483647  ;;  %1568 = vmin.xlane.f32.xlu1 %v2867_v56  ;;  %v1501_v30 = vpop.xlane.xlu1 %1500  ;;  %v1595_v29 = vshra.s32 %v2870_v21, 16 }
0x18ff   :  { %vm1509_vm13 = vcmp.eq.f32.partialorder %v2793_v44, %v1501_v30  ;;  %v1498_v43 = vpop.xlane.xlu0 %1497  ;;  %1553 = vmin.xlane.f32.xlu0 %v2873_v40  ;;  %v1580_v34 = vshra.s32 %v2876_v24, 16 }
0x1900   :  { %vm1508_vm14 = vcmp.eq.f32.partialorder %v2798_v46, %v1498_v43  ;;  %v1517_v45 = vsel %vm1509_vm13, %v2448_v20, 8  ;;  %v2888_v44 = vcvt.s32.f32 %v1595_v29  ;;  %v1519_v29 = vand.u32 65535, %v2830_v1 }
0x1901   :  { %v1516_v47 = vsel %vm1508_vm14, %v2448_v20, 8  ;;  %v2891_v48 = vsel %vm1477_vm6, %v1517_v45, 2147483647  ;;  %v2893_v46 = vcvt.s32.f32 %v1580_v34  ;;  %v2280_v49 = vpop.eup %2279  ;;  %v1534_v34 = vand.u32 65535, %v2834_v4 }
0x1902   :  { %1690 = vadd.xlane.f32.xlu1 %v1689_v54  ;;  %v2896_v50 = vsel %vm1477_vm6, %v1516_v47, 2147483647  ;;  %v2282_v51 = vpop.eup %2281  ;;  %v1625_v58 = vshra.s32 %v2891_v48, 16  ;;  %v1695_v59 = vsel %vm1477_vm6, %v2280_v49, 0.0  ;;  %v2914_v0 = vpop.xlane.xlu1 %1654  ;;  %v1549_v1 = vand.u32 65535, %v2860_v35 }
0x1903   :  { %1687 = vadd.xlane.f32.xlu0 %v1686_v23  ;;  %v1610_v60 = vshra.s32 %v2896_v50, 16  ;;  %v1692_v61 = vsel %vm1477_vm6, %v2282_v51, 0.0  ;;  %v2916_v2 = vpop.xlane.xlu0 %1651  ;;  %v1667_v5 = vsub.f32 %v2750_v38, %v2914_v0  ;;  %v1521_v23 = vcvt.s32.f32 %v1519_v29 }
0x1904   :  { %v2904_v62 = vcvt.s32.f32 %v1625_v58  ;;  %v1666_v12 = vsub.f32 %v2757_v57, %v2916_v2  ;;  %v1536_v49 = vcvt.s32.f32 %v1534_v34 }
0x1905   :  { %v2906_v63 = vcvt.s32.f32 %v1610_v60  ;;  %v1680_v8 = vmul.f32 1.442695, %v1667_v5 }
0x1906   :  { %1598 = vmin.xlane.f32.xlu1 %v2888_v44  ;;  %v2922_v32 = vpop.xlane.xlu1 %1660  ;;  %v1678_v11 = vmul.f32 1.442695, %v1666_v12 }
0x1907   :  { %1583 = vmin.xlane.f32.xlu0 %v2893_v46  ;;  %v2924_v6 = vpop.xlane.xlu0 %1657  ;;  %v1669_v9 = vsub.f32 %v2770_v53, %v2922_v32  ;;  %2283 = vpow2.f32 %v1680_v8  ;;  %v1579_v8 = vand.u32 65535, %v2876_v24  ;;  %v1624_v24 = vand.u32 65535, %v2891_v48 }
0x1908   :  { %v1668_v13 = vsub.f32 %v2777_v25, %v2924_v6  ;;  %2285 = vpow2.f32 %v1678_v11 }
0x1909   :  { %v1684_v14 = vmul.f32 1.442695, %v1669_v9 }
0x190a   :  { %1696 = vadd.xlane.f32.xlu1 %v1695_v59  ;;  %v1682_v31 = vmul.f32 1.442695, %v1668_v13  ;;  %v2934_v33 = vpop.permute.xlu1 %1809  ;;  %v1564_v59 = vand.u32 65535, %v2856_v18  ;;  %v1594_v18 = vand.u32 65535, %v2870_v21 }
0x190b   :  { %1693 = vadd.xlane.f32.xlu0 %v1692_v61  ;;  %2287 = vpow2.f32 %v1684_v14  ;;  %v2936_v43 = vpop.permute.xlu0 %1807 }
0x190c   :  { %2289 = vpow2.f32 %v1682_v31  ;;  %v1566_v61 = vcvt.s32.f32 %v1564_v59  ;;  %v1596_v11 = vcvt.s32.f32 %v1594_v18 }
0x190e   :  { %1628 = vmin.xlane.f32.xlu1 %v2904_v62  ;;  %v2939_v54 = vpop.permute.xlu1 %1811 }
0x190f   :  { %1613 = vmin.xlane.f32.xlu0 %v2906_v63 }
0x1911   :  { %v2284_v36 = vpop.eup %2283 }
0x1912   :  { %v2286_v37 = vpop.eup %2285  ;;  %v1701_v19 = vsel %vm1477_vm6, %v2284_v36, 0.0  ;;  %v1609_v36 = vand.u32 65535, %v2896_v50 }
0x1913   :  { %v1698_v26 = vsel %vm1477_vm6, %v2286_v37, 0.0 }
0x1915   :  { %v2288_v22 = vpop.eup %2287 }
0x1916   :  { %v2290_v39 = vpop.eup %2289  ;;  %v1707_v42 = vsel %vm1477_vm6, %v2288_v22, 0.0 }
0x1917   :  { %v1704_v30 = vsel %vm1477_vm6, %v2290_v39, 0.0 }
0x191f   :  { %1815 = vrot.lane.b32.xlu1 %v2757_v57, %s2313_s10 }
0x1925   :  { %1813 = vrot.lane.b32.xlu0 %v2738_v15, %s2313_s10 }
0x1943   :  { %1702 = vadd.xlane.f32.xlu1 %v1701_v19  ;;  %v1626_v19 = vcvt.s32.f32 %v1624_v24 }
0x1944   :  { %1699 = vadd.xlane.f32.xlu0 %v1698_v26 }
0x1947   :  { %1708 = vadd.xlane.f32.xlu1 %v1707_v42 }
0x1948   :  { %1705 = vadd.xlane.f32.xlu0 %v1704_v30 }
0x1983   :  { %v1524_v45 = vpop.xlane.xlu0 %1523 }
0x1984   :  { %v1539_v47 = vpop.xlane.xlu1 %1538  ;;  %vm1525_vm15 = vcmp.eq.f32.partialorder %v2844_v41, %v1524_v45  ;;  %v1551_v41 = vcvt.s32.f32 %v1549_v1  ;;  %v1530_v30 = vcvt.f32.s32 %v1524_v45 }
0x1985   :  { %v1526_v51 = vsel %vm1525_vm15, %v1521_v23, inf  ;;  %vm1540_vm0 = vcmp.eq.f32.partialorder %v2848_v7, %v1539_v47  ;;  %v1545_v29 = vcvt.f32.s32 %v1539_v47 }
0x1986   :  { %1527 = vmin.xlane.f32.xlu0 %v1526_v51  ;;  %v1541_v58 = vsel %vm1540_vm0, %v1536_v49, inf  ;;  %v1531_v23 = vshll.u32 %v1530_v30, 16 }
0x1987   :  { %1542 = vmin.xlane.f32.xlu1 %v1541_v58  ;;  %v1546_v58 = vshll.u32 %v1545_v29, 16 }
0x198b   :  { %v2946_v60 = vpop.xlane.xlu1 %1568 }
0x198c   :  { %v2948_v4 = vpop.xlane.xlu0 %1553  ;;  %vm1570_vm1 = vcmp.eq.f32.partialorder %v2867_v56, %v2946_v60 }
0x198d   :  { %v1571_v5 = vsel %vm1570_vm1, %v1566_v61, inf  ;;  %vm1555_vm3 = vcmp.eq.f32.partialorder %v2873_v40, %v2948_v4  ;;  %v1581_v40 = vcvt.s32.f32 %v1579_v8  ;;  %v1560_v45 = vcvt.f32.s32 %v2948_v4 }
0x198e   :  { %1572 = vmin.xlane.f32.xlu1 %v1571_v5  ;;  %v1556_v7 = vsel %vm1555_vm3, %v1551_v41, inf  ;;  %v1575_v41 = vcvt.f32.s32 %v2946_v60 }
0x198f   :  { %1557 = vmin.xlane.f32.xlu0 %v1556_v7  ;;  %v2954_v12 = vpop.xlane.xlu1 %1690 }
0x1990   :  { %v2957_v35 = vpop.xlane.xlu0 %1687  ;;  %v1576_v8 = vshll.u32 %v1575_v41, 16 }
0x1991   :  { %2291 = vlog2.f32 %v2957_v35 }
0x1992   :  { %2293 = vlog2.f32 %v2954_v12 }
0x1993   :  { %v2960_v9 = vpop.xlane.xlu1 %1598 }
0x1994   :  { %v2962_v56 = vpop.xlane.xlu0 %1583  ;;  %vm1600_vm4 = vcmp.eq.f32.partialorder %v2888_v44, %v2960_v9 }
0x1995   :  { %v1601_v13 = vsel %vm1600_vm4, %v1596_v11, inf  ;;  %vm1585_vm5 = vcmp.eq.f32.partialorder %v2893_v46, %v2962_v56  ;;  %v1611_v46 = vcvt.s32.f32 %v1609_v36  ;;  %v1605_v36 = vcvt.f32.s32 %v2960_v9 }
0x1996   :  { %1602 = vmin.xlane.f32.xlu1 %v1601_v13  ;;  %v1586_v14 = vsel %vm1585_vm5, %v1581_v40, inf }
0x1997   :  { %1587 = vmin.xlane.f32.xlu0 %v1586_v14  ;;  %v2968_v21 = vpop.xlane.xlu1 %1696 }
0x1998   :  { %v2971_v31 = vpop.xlane.xlu0 %1693  ;;  %2295 = vlog2.f32 %v2968_v21 }
0x1999   :  { %2297 = vlog2.f32 %v2971_v31 }
0x199b   :  { %v2974_v37 = vpop.xlane.xlu1 %1628 }
0x199c   :  { %v2976_v44 = vpop.xlane.xlu0 %1613  ;;  %vm1630_vm7 = vcmp.eq.f32.partialorder %v2904_v62, %v2974_v37 }
0x199d   :  { %v1631_v22 = vsel %vm1630_vm7, %v1626_v19, inf  ;;  %vm1615_vm8 = vcmp.eq.f32.partialorder %v2906_v63, %v2976_v44 }
0x199e   :  { %1632 = vmin.xlane.f32.xlu1 %v1631_v22  ;;  %v1616_v26 = vsel %vm1615_vm8, %v1611_v46, inf }
0x199f   :  { %1617 = vmin.xlane.f32.xlu0 %v1616_v26  ;;  %v2986_v50 = vpop.permute.xlu1 %1815 }
0x19a0   :  { %v1814_v48 = vpop.permute.xlu0 %1813 }
0x19af   :  { %1819 = vrot.lane.b32.xlu1 %v2777_v25, %s2313_s10 }
0x19b5   :  { %1817 = vrot.lane.b32.xlu0 %v2750_v38, %s2313_s10 }
0x19d0   :  { %v2990_v62 = vpop.xlane.xlu1 %1702 }
0x19d1   :  { %v2988_v39 = vpop.xlane.xlu0 %1699  ;;  %2299 = vlog2.f32 %v2990_v62 }
0x19d2   :  { %2301 = vlog2.f32 %v2988_v39 }
0x19d4   :  { %v2994_v63 = vpop.xlane.xlu1 %1708 }
0x19d5   :  { %v2992_v42 = vpop.xlane.xlu0 %1705 }
0x19d6   :  { %2303 = vlog2.f32 %v2992_v42 }
0x19d7   :  { %2305 = vlog2.f32 %v2994_v63 }
0x1a13   :  { %v1528_v34 = vpop.xlane.xlu0 %1527 }
0x1a14   :  { %v1529_v49 = vcvt.f32.s32 %v1528_v34  ;;  %v1543_v51 = vpop.xlane.xlu1 %1542 }
0x1a15   :  { %v1544_v59 = vcvt.f32.s32 %v1543_v51  ;;  %v1635_v51 = vcvt.f32.s32 %v2974_v37 }
0x1a16   :  { %v1532_v1 = vadd.s32 %v1531_v23, %v1529_v49 }
0x1a17   :  { %v1547_v61 = vadd.s32 %v1546_v58, %v1544_v59 }
0x1a18   :  { %v1782_v5 = vcvt.s32.f32 %v1532_v1  ;;  %vm1734_vm10 = vcmp.eq.s32.totalorder %v2448_v20, %v1532_v1 }
0x1a19   :  { %v1783_v7 = vcvt.s32.f32 %v1547_v61  ;;  %v1742_v47 = vsel %vm1734_vm10, %v2724_v16, 0.0  ;;  %vm1735_vm12 = vcmp.eq.s32.totalorder %v2448_v20, %v1547_v61 }
0x1a1a   :  { %1791 = vst.msk [vmem:[%s3161_s11] sm:$0xff] %vm1790_vm9, %v1782_v5  ;;  %v1750_v18 = vsel %vm1477_vm6, %v1742_v47, 0.0  ;;  %v1743_v60 = vsel %vm1735_vm12, %v2716_v28, 0.0  ;;  %v1561_v28 = vshll.u32 %v1560_v45, 16 }
0x1a1b   :  { %1792 = vst.msk [vmem:[%s3161_s11 + $0x8] sm:$0xff] %vm1790_vm9, %v1783_v7  ;;  %1751 = vadd.xlane.f32.xlu0 %v1750_v18  ;;  %v1573_v4 = vpop.xlane.xlu1 %1572  ;;  %v1753_v16 = vsel %vm1477_vm6, %v1743_v60, 0.0 }
0x1a1c   :  { %1832 = vst.msk [vmem:[%s3161_s11] sm:$0xff] %vm1831_vm11, %v2936_v43  ;;  %v1574_v11 = vcvt.f32.s32 %v1573_v4  ;;  %v1558_v40 = vpop.xlane.xlu0 %1557  ;;  %1754 = vadd.xlane.f32.xlu1 %v1753_v16  ;;  %1833 = vst.msk [vmem:[%s3161_s11 + $0x8] sm:$0xff] %vm1831_vm11, %v2934_v33  ;;  %v1590_v43 = vcvt.f32.s32 %v2962_v56  ;;  %v1606_v56 = vshll.u32 %v1605_v36, 16 }
0x1a1d   :  { %v1559_v13 = vcvt.f32.s32 %v1558_v40 }
0x1a1e   :  { %v1577_v14 = vadd.s32 %v1576_v8, %v1574_v11 }
0x1a1f   :  { %v1562_v24 = vadd.s32 %v1561_v28, %v1559_v13 }
0x1a20   :  { %v1785_v19 = vcvt.s32.f32 %v1577_v14  ;;  %vm1737_vm13 = vcmp.eq.s32.totalorder %v2448_v20, %v1577_v14 }
0x1a21   :  { %v1784_v46 = vcvt.s32.f32 %v1562_v24  ;;  %v1745_v22 = vsel %vm1737_vm13, %v2738_v15, 0.0  ;;  %vm1736_vm14 = vcmp.eq.s32.totalorder %v2448_v20, %v1562_v24 }
0x1a22   :  { %1794 = vst.msk [vmem:[%s3161_s11 + $0x18] sm:$0xff] %vm1790_vm9, %v1785_v19  ;;  %v1759_v33 = vsel %vm1477_vm6, %v1745_v22, 0.0  ;;  %v1744_v26 = vsel %vm1736_vm14, %v2740_v17, 0.0  ;;  %v1591_v17 = vshll.u32 %v1590_v43, 16 }
0x1a23   :  { %1793 = vst.msk [vmem:[%s3161_s11 + $0x10] sm:$0xff] %vm1790_vm9, %v1784_v46  ;;  %1760 = vadd.xlane.f32.xlu1 %v1759_v33  ;;  %v1603_v9 = vpop.xlane.xlu1 %1602  ;;  %v1756_v15 = vsel %vm1477_vm6, %v1744_v26, 0.0 }
0x1a24   :  { %1835 = vst.msk [vmem:[%s3161_s11 + $0x18] sm:$0xff] %vm1831_vm11, %v1814_v48  ;;  %v1604_v30 = vcvt.f32.s32 %v1603_v9  ;;  %1757 = vadd.xlane.f32.xlu0 %v1756_v15  ;;  %v1588_v29 = vpop.xlane.xlu0 %1587  ;;  %1834 = vst.msk [vmem:[%s3161_s11 + $0x10] sm:$0xff] %vm1831_vm11, %v2939_v54  ;;  %v1620_v48 = vcvt.f32.s32 %v2976_v44  ;;  %v1636_v44 = vshll.u32 %v1635_v51, 16 }
0x1a25   :  { %v1589_v34 = vcvt.f32.s32 %v1588_v29 }
0x1a26   :  { %v1607_v23 = vadd.s32 %v1606_v56, %v1604_v30 }
0x1a27   :  { %v1592_v49 = vadd.s32 %v1591_v17, %v1589_v34 }
0x1a28   :  { %v1787_v58 = vcvt.s32.f32 %v1607_v23  ;;  %vm1739_vm15 = vcmp.eq.s32.totalorder %v2448_v20, %v1607_v23 }
0x1a29   :  { %v1786_v59 = vcvt.s32.f32 %v1592_v49  ;;  %v1747_v1 = vsel %vm1739_vm15, %v2750_v38, 0.0  ;;  %vm1738_vm0 = vcmp.eq.s32.totalorder %v2448_v20, %v1592_v49 }
0x1a2a   :  { %1796 = vst.msk [vmem:[%s3161_s11 + $0x28] sm:$0xff] %vm1790_vm9, %v1787_v58  ;;  %v1765_v54 = vsel %vm1477_vm6, %v1747_v1, 0.0  ;;  %v1746_v61 = vsel %vm1738_vm0, %v2757_v57, 0.0  ;;  %v1621_v57 = vshll.u32 %v1620_v48, 16 }
0x1a2b   :  { %1795 = vst.msk [vmem:[%s3161_s11 + $0x20] sm:$0xff] %vm1790_vm9, %v1786_v59  ;;  %1766 = vadd.xlane.f32.xlu1 %v1765_v54  ;;  %v1633_v37 = vpop.xlane.xlu1 %1632  ;;  %v1762_v38 = vsel %vm1477_vm6, %v1746_v61, 0.0 }
0x1a2c   :  { %v1634_v41 = vcvt.f32.s32 %v1633_v37  ;;  %1763 = vadd.xlane.f32.xlu0 %v1762_v38  ;;  %v1618_v5 = vpop.xlane.xlu0 %1617  ;;  %1836 = vst.msk [vmem:[%s3161_s11 + $0x20] sm:$0xff] %vm1831_vm11, %v2986_v50 }
0x1a2d   :  { %v1619_v45 = vcvt.f32.s32 %v1618_v5 }
0x1a2e   :  { %v1637_v7 = vadd.s32 %v1636_v44, %v1634_v41 }
0x1a2f   :  { %v1622_v47 = vadd.s32 %v1621_v57, %v1619_v45  ;;  %v1820_v11 = vpop.permute.xlu1 %1819 }
0x1a30   :  { %v1789_v18 = vcvt.s32.f32 %v1637_v7  ;;  %v1818_v60 = vpop.permute.xlu0 %1817  ;;  %vm1741_vm1 = vcmp.eq.s32.totalorder %v2448_v20, %v1637_v7 }
0x1a31   :  { %v1788_v4 = vcvt.s32.f32 %v1622_v47  ;;  %1837 = vst.msk [vmem:[%s3161_s11 + $0x28] sm:$0xff] %vm1831_vm11, %v1818_v60  ;;  %v1749_v16 = vsel %vm1741_vm1, %v2770_v53, 0.0  ;;  %vm1740_vm3 = vcmp.eq.s32.totalorder %v2448_v20, %v1622_v47  ;;  %v2292_v20 = vpop.eup %2291 }
0x1a32   :  { %1798 = vst.msk [vmem:[%s3161_s11 + $0x38] sm:$0xff] %vm1790_vm9, %v1789_v18  ;;  %v1771_v50 = vsel %vm1477_vm6, %v1749_v16, 0.0  ;;  %v1748_v8 = vsel %vm1740_vm3, %v2777_v25, 0.0  ;;  %v2294_v25 = vpop.eup %2293  ;;  %v1711_v28 = vmul.f32 0.6931472, %v2292_v20 }
0x1a33   :  { %1797 = vst.msk [vmem:[%s3161_s11 + $0x30] sm:$0xff] %vm1790_vm9, %v1788_v4  ;;  %1772 = vadd.xlane.f32.xlu1 %v1771_v50  ;;  %v1768_v40 = vsel %vm1477_vm6, %v1748_v8, 0.0  ;;  %v1713_v13 = vmul.f32 0.6931472, %v2294_v25  ;;  %v2296_v14 = vpop.eup %2295  ;;  %vm1840_vm6 = vcmask 23568  }
0x1a34   :  { %1838 = vst.msk [vmem:[%s3161_s11 + $0x30] sm:$0xff] %vm1831_vm11, %v1820_v11  ;;  %1769 = vadd.xlane.f32.xlu0 %v1768_v40  ;;  %v2298_v12 = vpop.eup %2297  ;;  %v1717_v31 = vmul.f32 0.6931472, %v2296_v14 }
0x1a35   :  { %v1727_v35 = vadd.f32 %v1713_v13, %v2818_v52  ;;  %v1715_v62 = vmul.f32 0.6931472, %v2298_v12 }
0x1a36   :  { %v1729_v52 = vadd.f32 %v1717_v31, %v2836_v10 }
0x1a37   :  { %v1728_v19 = vadd.f32 %v1715_v62, %v2839_v27 }
0x1a44   :  { %1041 = vrot.lane.b32.xlu1 %v2650_v3, %s2314_s4  ;;  %v1726_v3 = vadd.f32 %v1711_v28, %v2820_v55  ;;  %v2300_v55 = vpop.eup %2299 }
0x1a45   :  { %v2302_v43 = vpop.eup %2301  ;;  %v1721_v26 = vmul.f32 0.6931472, %v2300_v55 }
0x1a46   :  { %v1719_v9 = vmul.f32 0.6931472, %v2302_v43  ;;  %v2304_v15 = vpop.eup %2303 }
0x1a47   :  { %v1731_v10 = vadd.f32 %v1721_v26, %v2914_v0  ;;  %v2306_v29 = vpop.eup %2305  ;;  %v1723_v17 = vmul.f32 0.6931472, %v2304_v15 }
0x1a48   :  { %v1730_v42 = vadd.f32 %v1719_v9, %v2916_v2  ;;  %v1725_v0 = vmul.f32 0.6931472, %v2306_v29 }
0x1a49   :  { %v1732_v2 = vadd.f32 %v1723_v17, %v2924_v6 }
0x1a4a   :  { %1821 = vrot.lane.b32.xlu0 %v2770_v53, %s2313_s10  ;;  %v1733_v51 = vadd.f32 %v1725_v0, %v2922_v32 }
0x1aa8   :  { %v1752_v53 = vpop.xlane.xlu0 %1751 }
0x1aa9   :  { %v1774_v24 = vsub.f32 %v1752_v53, %v1726_v3  ;;  %v1755_v21 = vpop.xlane.xlu1 %1754 }
0x1aaa   :  { %v1775_v36 = vsub.f32 %v1755_v21, %v1727_v35 }
0x1aab   :  { %1841 = vst.msk [vmem:[%s3161_s11] sm:$0xff] %vm1840_vm6, %v1774_v24 }
0x1aac   :  { %1842 = vst.msk [vmem:[%s3161_s11 + $0x8] sm:$0xff] %vm1840_vm6, %v1775_v36 }
0x1ab0   :  { %v1761_v39 = vpop.xlane.xlu1 %1760 }
0x1ab1   :  { %v1777_v46 = vsub.f32 %v1761_v39, %v1729_v52  ;;  %v1758_v22 = vpop.xlane.xlu0 %1757 }
0x1ab2   :  { %v1776_v33 = vsub.f32 %v1758_v22, %v1728_v19 }
0x1ab3   :  { %1844 = vst.msk [vmem:[%s3161_s11 + $0x18] sm:$0xff] %vm1840_vm6, %v1777_v46 }
0x1ab4   :  { %1843 = vst.msk [vmem:[%s3161_s11 + $0x10] sm:$0xff] %vm1840_vm6, %v1776_v33 }
0x1ab8   :  { %v1767_v27 = vpop.xlane.xlu1 %1766 }
0x1ab9   :  { %v1779_v63 = vsub.f32 %v1767_v27, %v1731_v10  ;;  %v1764_v56 = vpop.xlane.xlu0 %1763 }
0x1aba   :  { %v1778_v30 = vsub.f32 %v1764_v56, %v1730_v42 }
0x1abb   :  { %1846 = vst.msk [vmem:[%s3161_s11 + $0x28] sm:$0xff] %vm1840_vm6, %v1779_v63 }
0x1abc   :  { %1845 = vst.msk [vmem:[%s3161_s11 + $0x20] sm:$0xff] %vm1840_vm6, %v1778_v30 }
0x1ac0   :  { %v1773_v34 = vpop.xlane.xlu1 %1772 }
0x1ac1   :  { %v1770_v23 = vpop.xlane.xlu0 %1769  ;;  %v1781_v48 = vsub.f32 %v1773_v34, %v1733_v51 }
0x1ac2   :  { %v1780_v49 = vsub.f32 %v1770_v23, %v1732_v2 }
0x1ac4   :  { %1847 = vst.msk [vmem:[%s3161_s11 + $0x30] sm:$0xff] %vm1840_vm6, %v1780_v49  ;;  %v1042_v58 = vpop.permute.xlu1 %1041 }
0x1ac5   :  { %1882 = vst.msk [vmem:[%s3157_s12 + $0x8] sm:$0xff] %vm216_vm2, %v1042_v58  ;;  %v1822_v59 = vpop.permute.xlu0 %1821 }
0x1ac6   :  { %1839 = vst.msk [vmem:[%s3161_s11 + $0x38] sm:$0xff] %vm1831_vm11, %v1822_v59 }
0x1ac7   :  { %1848 = vst.msk [vmem:[%s3161_s11 + $0x38] sm:$0xff] %vm1840_vm6, %v1781_v48 }

</bundles_post_ra>
